<compile_context>
chip_gen: v7x
topology: tpu7x:2x2x1
jax: 0.10.0
libtpu: 0.0.40
codegen_flags: <defaults>
</compile_context>

<pallas_src>
import numpy as np
import jax
import jax.numpy as jnp
from jax.experimental import pallas as pl
from jax.experimental.pallas import tpu as pltpu

EMB_DIM = 128
CONV_OUT = 64
KERNEL_SIZES = (2, 3, 4)
FEAT_DIM = CONV_OUT * len(KERNEL_SIZES)          # 192
FEAT_PAD = 256                                   # lane-dense: 2 full 128-lane vregs
LEAKY_SLOPE = 0.01                               # nn.LeakyReLU default
GATHER_WEIGHT_BUDGET = 8 * 1024 * 1024           # max bytes for the fused gather weight G
VMEM_LIMIT_BYTES = 48 * 1024 * 1024


def _leaky_relu(x):
    return jnp.where(x > 0, x, LEAKY_SLOPE * x)


def _round_up(x, m):
    return ((x + m - 1) // m) * m


def _choose_batch_tiling(B, tb_max, align):
    """(tile, padded_batch, num_tiles): snug padding; >=2 tiles for larger batches (megacore)."""
    tb_max = max(align, (tb_max // align) * align)
    n = -(-B // tb_max)                          # cdiv
    if n < 2 and B > 2 * align:
        n = 2                                    # keep the second v7x TensorCore busy
    tb = _round_up(-(-B // n), align)
    return tb, tb * n, n


# ----------------------------- kernels ---------------------------------------------------------


def textcnn_gather_kernel(ids_ref, g_ref, bf_ref, wp_ref, bp_ref, out_ref):
    # ids_ref: (TB, L)          int32  token ids for this batch tile
    # g_ref  : (L, V_pad, 256)  f32    table @ time-fused conv+pool weight (resident)
    # bf_ref : (1, 256)         f32    concatenated conv biases (lane padded)
    # wp_ref : (256, O_pad)     f32    Linear weight (transposed, padded)
    # bp_ref : (1, O_pad)       f32
    # out_ref: (TB, O_pad)      f32    lane-dense output tile
    ids = ids_ref[...]
    tb, L = ids.shape
    v_pad = g_ref.shape[1]
    lane = jax.lax.broadcasted_iota(jnp.int32, (tb, v_pad), 1)
    feats = jnp.zeros((tb, FEAT_PAD), jnp.float32)
    for t in range(L):                           # static unroll: L small matmuls on the MXU
        onehot = (lane == ids[:, t:t + 1]).astype(jnp.float32)      # exact 0/1 selector
        feats = feats + jnp.dot(onehot, g_ref[t], preferred_element_type=jnp.float32)
    feats = _leaky_relu(feats + bf_ref[...])
    out = jnp.dot(feats, wp_ref[...], preferred_element_type=jnp.float32) + bp_ref[...]
    out_ref[...] = out.astype(out_ref.dtype)


def textcnn_timefused_kernel(embf_ref, wt_ref, bf_ref, wp_ref, bp_ref, out_ref):
    # embf_ref: (TB, L*128) bf16 -- gathered embeddings, time axis folded into lanes
    # wt_ref  : (L*128, 256) bf16 -- time-fused conv+pool weight (resident)
    feats = jnp.dot(embf_ref[...], wt_ref[...], preferred_element_type=jnp.float32) + bf_ref[...]
    feats = _leaky_relu(feats)
    out = jnp.dot(feats, wp_ref[...], preferred_element_type=jnp.float32) + bp_ref[...]
    out_ref[...] = out.astype(out_ref.dtype)


# ----------------------------- weight preparation ----------------------------------------------


def _build_time_fused_weight(params, L):
    """W_time: (L, 128, FEAT_PAD).  Conv taps of all kernel sizes with the AdaptiveAvgPool1d(1)
    scale 1/T_k folded in, laid out so  pooled_feats = bias + sum_t emb[t] @ W_time[t]."""
    wt = np.zeros((L, EMB_DIM, FEAT_PAD), np.float32)
    bf = np.zeros((1, FEAT_PAD), np.float32)
    for ki, k in enumerate(KERNEL_SIZES):
        T = L - k + 1
        w = np.asarray(params["conv_w"][k], np.float32)            # (64, 128, k) PyTorch layout
        c0 = ki * CONV_OUT
        for j in range(k):
            # tap j touches emb rows t = p + j for conv positions p in [0, T-1]
            wt[j:j + T, :, c0:c0 + CONV_OUT] += w[:, :, j].T[None] / float(T)
        bf[0, c0:c0 + CONV_OUT] = np.asarray(params["conv_b"][k], np.float32)
    return jnp.asarray(wt), jnp.asarray(bf)


# ----------------------------- forward wrapper --------------------------------------------------


def textcnn_forward(texts, params, *, gather_in_kernel=None, batch_tile=None):
    """texts: (B, L) int token ids.  Returns (B, outputs_size) f32 (eval-mode forward)."""
    texts = jnp.asarray(texts, jnp.int32)
    B, L = texts.shape
    assert L >= max(KERNEL_SIZES), "sequence length must be >= largest conv kernel size"
    table = jnp.asarray(params["embedding"], jnp.float32)          # (V, 128)
    V = int(table.shape[0])
    O = int(params["pred_b"].shape[-1])
    o_pad = _round_up(max(O, 1), 128)

    wt, bf = _build_time_fused_weight(params, L)                   # (L,128,256), (1,256)
    wp = jnp.zeros((FEAT_PAD, o_pad), jnp.float32).at[:FEAT_DIM, :O].set(
        jnp.asarray(params["pred_w"], jnp.float32).T)
    bp = jnp.zeros((1, o_pad), jnp.float32).at[:, :O].set(
        jnp.asarray(params["pred_b"], jnp.float32).reshape(1, O))

    v_pad = _round_up(V, 128)
    fused_gather_bytes = L * v_pad * FEAT_PAD * 4
    if gather_in_kernel is None:
        gather_in_kernel = fused_gather_bytes <= GATHER_WEIGHT_BUDGET

    cparams = pltpu.CompilerParams(dimension_semantics=("parallel",),
                                   vmem_limit_bytes=VMEM_LIMIT_BYTES)

    if gather_in_kernel:
        # ---- Path A: gather fused into the kernel (one-hot matmul against precontracted G). ----
        # G[t] = table @ W_time[t]; static given the weights, would be cached in deployment.
        table_pad = jnp.zeros((v_pad, EMB_DIM), jnp.float32).at[:V].set(table)
        g = jnp.einsum("vc,tcf->tvf", table_pad, wt)               # (L, v_pad, 256) f32
        tb, b_pad, n_tiles = _choose_batch_tiling(B, batch_tile or 512, 8)
        ids = texts if b_pad == B else jnp.pad(texts, ((0, b_pad - B), (0, 0)))
        out = pl.pallas_call(
            textcnn_gather_kernel,
            out_shape=jax.ShapeDtypeStruct((b_pad, o_pad), jnp.float32),
            grid_spec=pltpu.PrefetchScalarGridSpec(
                num_scalar_prefetch=0,
                grid=(n_tiles,),
                in_specs=[
                    pl.BlockSpec((tb, L), lambda i: (i, 0)),                    # token-id tiles
                    pl.BlockSpec((L, v_pad, FEAT_PAD), lambda i: (0, 0, 0)),    # resident G
                    pl.BlockSpec((1, FEAT_PAD), lambda i: (0, 0)),
                    pl.BlockSpec((FEAT_PAD, o_pad), lambda i: (0, 0)),
                    pl.BlockSpec((1, o_pad), lambda i: (0, 0)),
                ],
                out_specs=pl.BlockSpec((tb, o_pad), lambda i: (i, 0)),
            ),
            compiler_params=cparams,
        )(ids, g, bf, wp, bp)
    else:
        # ---- Path B: wrapper gather, bf16 embedding stream, one time-fused MXU matmul. ----
        embf = jnp.take(table, texts, axis=0).reshape(B, L * EMB_DIM).astype(jnp.bfloat16)
        wtf = wt.reshape(L * EMB_DIM, FEAT_PAD).astype(jnp.bfloat16)
        tb_budget = max(16, (16 * 1024 * 1024) // (2 * L * EMB_DIM * 2))  # ~16 MiB emb stream
        tb, b_pad, n_tiles = _choose_batch_tiling(B, min(batch_tile or 1024, tb_budget), 16)
        if b_pad != B:
            embf = jnp.pad(embf, ((0, b_pad - B), (0, 0)))
        out = pl.pallas_call(
            textcnn_timefused_kernel,
            out_shape=jax.ShapeDtypeStruct((b_pad, o_pad), jnp.float32),
            grid_spec=pltpu.PrefetchScalarGridSpec(
                num_scalar_prefetch=0,
                grid=(n_tiles,),
                in_specs=[
                    pl.BlockSpec((tb, L * EMB_DIM), lambda i: (i, 0)),          # bf16 emb tiles
                    pl.BlockSpec((L * EMB_DIM, FEAT_PAD), lambda i: (0, 0)),    # resident weight
                    pl.BlockSpec((1, FEAT_PAD), lambda i: (0, 0)),
                    pl.BlockSpec((FEAT_PAD, o_pad), lambda i: (0, 0)),
                    pl.BlockSpec((1, o_pad), lambda i: (0, 0)),
                ],
                out_specs=pl.BlockSpec((tb, o_pad), lambda i: (i, 0)),
            ),
            compiler_params=cparams,
        )(embf, wtf, bf, wp, bp)
    return out[:B, :O]


# ----------------------------- reference & test harness ----------------------------------------


def init_params(vocab_size, outputs_size, key):
    ks = jax.random.split(key, 9)
    emb = jax.random.normal(ks[0], (vocab_size, EMB_DIM), jnp.float32) * 0.1
    emb = emb.at[0].set(0.0)                                        # padding_idx=0

    conv_w, conv_b = {}, {}
    for i, k in enumerate(KERNEL_SIZES):
        # PyTorch Conv1d weight layout: (out=64, in=128, k)
        conv_w[k] = jax.random.normal(ks[1 + i], (CONV_OUT, EMB_DIM, k), jnp.float32) * 0.05
        conv_b[k] = jax.random.normal(ks[4 + i], (CONV_OUT,), jnp.float32) * 0.05

    # PyTorch Linear weight layout: (O, 192)
    pred_w = jax.random.normal(ks[7], (outputs_size, FEAT_DIM), jnp.float32) * 0.05
    pred_b = jax.random.normal(ks[8], (outputs_size,), jnp.float32) * 0.05

    return {"embedding": emb, "conv_w": conv_w, "conv_b": conv_b,
            "pred_w": pred_w, "pred_b": pred_b}


def reference_forward(texts, params):
    """Pure-JAX reference following the PyTorch module directly (eval mode)."""
    emb = jnp.take(params["embedding"], texts, axis=0)              # (B, L, 128)
    B, L, _ = emb.shape
    feats = []
    for k in KERNEL_SIZES:
        w = params["conv_w"][k]                                     # (64, 128, k)
        b = params["conv_b"][k]
        T = L - k + 1
        conv = jnp.zeros((B, T, CONV_OUT), jnp.float32)
        for j in range(k):
            conv = conv + jnp.einsum("btc,oc->bto", emb[:, j:j + T, :], w[:, :, j])
        conv = conv + b
        pooled = jnp.mean(conv, axis=1)                             # AdaptiveAvgPool1d(1)
        feats.append(_leaky_relu(pooled))
    cat = jnp.concatenate(feats, axis=1)                            # (B, 192)
    return cat @ params["pred_w"].T + params["pred_b"]


if __name__ == "__main__":
    vocab_size = 100
    outputs_size = 8
    L = 16

    key = jax.random.PRNGKey(0)
    k_params, k_texts1, k_texts2 = jax.random.split(key, 3)
    params = init_params(vocab_size, outputs_size, k_params)

    # Primary small-shape check (fused-gather Path A).
    texts = jax.random.randint(k_texts1, (2, L), 0, vocab_size, dtype=jnp.int32)
    out = textcnn_forward(texts, params)
    jax.block_until_ready(out)
    assert out.shape == (2, outputs_size)
    ref = reference_forward(texts, params)
    np.testing.assert_allclose(np.asarray(out), np.asarray(ref), rtol=1e-4, atol=1e-4)

    # Multi-tile grid + batch padding (still Path A, f32-exact).
    texts_b = jax.random.randint(k_texts2, (50, L), 0, vocab_size, dtype=jnp.int32)
    out_b = textcnn_forward(texts_b, params)
    jax.block_until_ready(out_b)
    ref_b = reference_forward(texts_b, params)
    np.testing.assert_allclose(np.asarray(out_b), np.asarray(ref_b), rtol=1e-4, atol=1e-4)

    # Fallback Path B (bf16 embedding stream + single time-fused matmul), forced.
    out_c = textcnn_forward(texts_b, params, gather_in_kernel=False)
    jax.block_until_ready(out_c)
    np.testing.assert_allclose(np.asarray(out_c), np.asarray(ref_b), rtol=5e-2, atol=5e-3)

    print("KERNEL_OK")
</pallas_src>

<mosaic_0001>
module attributes {stable_mosaic.version = 11 : i64} {
  func.func @textcnn_gather_kernel(%arg0: i32, %arg1: memref<8x16xi32, #tpu.memory_space<vmem>>, %arg2: memref<16x128x256xf32, #tpu.memory_space<vmem>>, %arg3: memref<1x256xf32, #tpu.memory_space<vmem>>, %arg4: memref<256x128xf32, #tpu.memory_space<vmem>>, %arg5: memref<1x128xf32, #tpu.memory_space<vmem>>, %arg6: memref<8x128xf32, #tpu.memory_space<vmem>>) attributes {dimension_semantics = [#tpu.dimension_semantics<parallel>], iteration_bounds = array<i64: 1>, scalar_prefetch = 0 : i64, scratch_operands = 0 : i64, tpu.core_type = #tpu.core_type<tc>, window_params = [{transform_indices = @transform_0, window_bounds = array<i64: 8, 16>}, {pipeline_mode = #tpu.pipeline_mode<synchronous>, transform_indices = @transform_1, window_bounds = array<i64: 16, 128, 256>}, {pipeline_mode = #tpu.pipeline_mode<synchronous>, transform_indices = @transform_2, window_bounds = array<i64: 1, 256>}, {pipeline_mode = #tpu.pipeline_mode<synchronous>, transform_indices = @transform_3, window_bounds = array<i64: 256, 128>}, {pipeline_mode = #tpu.pipeline_mode<synchronous>, transform_indices = @transform_4, window_bounds = array<i64: 1, 128>}, {transform_indices = @transform_5, window_bounds = array<i64: 8, 128>}]} {
    %c0 = arith.constant 0 : index
    %c0_0 = arith.constant 0 : index
    %0 = vector.load %arg1[%c0, %c0_0] : memref<8x16xi32, #tpu.memory_space<vmem>>, vector<8x16xi32>
    %1 = tpu.iota {dimensions = array<i32: 1>} : vector<8x128xi32>
    %cst = arith.constant 0.000000e+00 : f32
    %2 = vector.broadcast %cst : f32 to vector<8x256xf32>
    %3 = vector.extract_strided_slice %0 {offsets = [0, 0], sizes = [8, 1], strides = [1, 1]} : vector<8x16xi32> to vector<8x1xi32>
    %4 = vector.broadcast %3 : vector<8x1xi32> to vector<8x128xi32>
    %5 = arith.cmpi eq, %1, %4 : vector<8x128xi32>
    %6 = arith.extui %5 : vector<8x128xi1> to vector<8x128xi32>
    %7 = arith.sitofp %6 : vector<8x128xi32> to vector<8x128xf32>
    %c0_1 = arith.constant 0 : index
    %c0_2 = arith.constant 0 : index
    %c0_3 = arith.constant 0 : index
    %8 = vector.load %arg2[%c0_1, %c0_2, %c0_3] : memref<16x128x256xf32, #tpu.memory_space<vmem>>, vector<1x128x256xf32>
    %9 = vector.shape_cast %8 : vector<1x128x256xf32> to vector<128x256xf32>
    %cst_4 = arith.constant dense<0.000000e+00> : vector<8x256xf32>
    %10 = tpu.matmul %7, %9, %cst_4 {dimension_numbers = #tpu.dot_dimension_numbers<[1], [0], [0], [1], [0, 0, 1, 1], [], []>} : vector<8x128xf32>, vector<128x256xf32>, vector<8x256xf32> -> vector<8x256xf32>
    %11 = arith.addf %2, %10 : vector<8x256xf32>
    %12 = vector.extract_strided_slice %0 {offsets = [0, 1], sizes = [8, 1], strides = [1, 1]} : vector<8x16xi32> to vector<8x1xi32>
    %13 = vector.broadcast %12 : vector<8x1xi32> to vector<8x128xi32>
    %14 = arith.cmpi eq, %1, %13 : vector<8x128xi32>
    %15 = arith.extui %14 : vector<8x128xi1> to vector<8x128xi32>
    %16 = arith.sitofp %15 : vector<8x128xi32> to vector<8x128xf32>
    %c1 = arith.constant 1 : index
    %c0_5 = arith.constant 0 : index
    %c0_6 = arith.constant 0 : index
    %17 = vector.load %arg2[%c1, %c0_5, %c0_6] : memref<16x128x256xf32, #tpu.memory_space<vmem>>, vector<1x128x256xf32>
    %18 = vector.shape_cast %17 : vector<1x128x256xf32> to vector<128x256xf32>
    %cst_7 = arith.constant dense<0.000000e+00> : vector<8x256xf32>
    %19 = tpu.matmul %16, %18, %cst_7 {dimension_numbers = #tpu.dot_dimension_numbers<[1], [0], [0], [1], [0, 0, 1, 1], [], []>} : vector<8x128xf32>, vector<128x256xf32>, vector<8x256xf32> -> vector<8x256xf32>
    %20 = arith.addf %11, %19 : vector<8x256xf32>
    %21 = vector.extract_strided_slice %0 {offsets = [0, 2], sizes = [8, 1], strides = [1, 1]} : vector<8x16xi32> to vector<8x1xi32>
    %22 = vector.broadcast %21 : vector<8x1xi32> to vector<8x128xi32>
    %23 = arith.cmpi eq, %1, %22 : vector<8x128xi32>
    %24 = arith.extui %23 : vector<8x128xi1> to vector<8x128xi32>
    %25 = arith.sitofp %24 : vector<8x128xi32> to vector<8x128xf32>
    %c2 = arith.constant 2 : index
    %c0_8 = arith.constant 0 : index
    %c0_9 = arith.constant 0 : index
    %26 = vector.load %arg2[%c2, %c0_8, %c0_9] : memref<16x128x256xf32, #tpu.memory_space<vmem>>, vector<1x128x256xf32>
    %27 = vector.shape_cast %26 : vector<1x128x256xf32> to vector<128x256xf32>
    %cst_10 = arith.constant dense<0.000000e+00> : vector<8x256xf32>
    %28 = tpu.matmul %25, %27, %cst_10 {dimension_numbers = #tpu.dot_dimension_numbers<[1], [0], [0], [1], [0, 0, 1, 1], [], []>} : vector<8x128xf32>, vector<128x256xf32>, vector<8x256xf32> -> vector<8x256xf32>
    %29 = arith.addf %20, %28 : vector<8x256xf32>
    %30 = vector.extract_strided_slice %0 {offsets = [0, 3], sizes = [8, 1], strides = [1, 1]} : vector<8x16xi32> to vector<8x1xi32>
    %31 = vector.broadcast %30 : vector<8x1xi32> to vector<8x128xi32>
    %32 = arith.cmpi eq, %1, %31 : vector<8x128xi32>
    %33 = arith.extui %32 : vector<8x128xi1> to vector<8x128xi32>
    %34 = arith.sitofp %33 : vector<8x128xi32> to vector<8x128xf32>
    %c3 = arith.constant 3 : index
    %c0_11 = arith.constant 0 : index
    %c0_12 = arith.constant 0 : index
    %35 = vector.load %arg2[%c3, %c0_11, %c0_12] : memref<16x128x256xf32, #tpu.memory_space<vmem>>, vector<1x128x256xf32>
    %36 = vector.shape_cast %35 : vector<1x128x256xf32> to vector<128x256xf32>
    %cst_13 = arith.constant dense<0.000000e+00> : vector<8x256xf32>
    %37 = tpu.matmul %34, %36, %cst_13 {dimension_numbers = #tpu.dot_dimension_numbers<[1], [0], [0], [1], [0, 0, 1, 1], [], []>} : vector<8x128xf32>, vector<128x256xf32>, vector<8x256xf32> -> vector<8x256xf32>
    %38 = arith.addf %29, %37 : vector<8x256xf32>
    %39 = vector.extract_strided_slice %0 {offsets = [0, 4], sizes = [8, 1], strides = [1, 1]} : vector<8x16xi32> to vector<8x1xi32>
    %40 = vector.broadcast %39 : vector<8x1xi32> to vector<8x128xi32>
    %41 = arith.cmpi eq, %1, %40 : vector<8x128xi32>
    %42 = arith.extui %41 : vector<8x128xi1> to vector<8x128xi32>
    %43 = arith.sitofp %42 : vector<8x128xi32> to vector<8x128xf32>
    %c4 = arith.constant 4 : index
    %c0_14 = arith.constant 0 : index
    %c0_15 = arith.constant 0 : index
    %44 = vector.load %arg2[%c4, %c0_14, %c0_15] : memref<16x128x256xf32, #tpu.memory_space<vmem>>, vector<1x128x256xf32>
    %45 = vector.shape_cast %44 : vector<1x128x256xf32> to vector<128x256xf32>
    %cst_16 = arith.constant dense<0.000000e+00> : vector<8x256xf32>
    %46 = tpu.matmul %43, %45, %cst_16 {dimension_numbers = #tpu.dot_dimension_numbers<[1], [0], [0], [1], [0, 0, 1, 1], [], []>} : vector<8x128xf32>, vector<128x256xf32>, vector<8x256xf32> -> vector<8x256xf32>
    %47 = arith.addf %38, %46 : vector<8x256xf32>
    %48 = vector.extract_strided_slice %0 {offsets = [0, 5], sizes = [8, 1], strides = [1, 1]} : vector<8x16xi32> to vector<8x1xi32>
    %49 = vector.broadcast %48 : vector<8x1xi32> to vector<8x128xi32>
    %50 = arith.cmpi eq, %1, %49 : vector<8x128xi32>
    %51 = arith.extui %50 : vector<8x128xi1> to vector<8x128xi32>
    %52 = arith.sitofp %51 : vector<8x128xi32> to vector<8x128xf32>
    %c5 = arith.constant 5 : index
    %c0_17 = arith.constant 0 : index
    %c0_18 = arith.constant 0 : index
    %53 = vector.load %arg2[%c5, %c0_17, %c0_18] : memref<16x128x256xf32, #tpu.memory_space<vmem>>, vector<1x128x256xf32>
    %54 = vector.shape_cast %53 : vector<1x128x256xf32> to vector<128x256xf32>
    %cst_19 = arith.constant dense<0.000000e+00> : vector<8x256xf32>
    %55 = tpu.matmul %52, %54, %cst_19 {dimension_numbers = #tpu.dot_dimension_numbers<[1], [0], [0], [1], [0, 0, 1, 1], [], []>} : vector<8x128xf32>, vector<128x256xf32>, vector<8x256xf32> -> vector<8x256xf32>
    %56 = arith.addf %47, %55 : vector<8x256xf32>
    %57 = vector.extract_strided_slice %0 {offsets = [0, 6], sizes = [8, 1], strides = [1, 1]} : vector<8x16xi32> to vector<8x1xi32>
    %58 = vector.broadcast %57 : vector<8x1xi32> to vector<8x128xi32>
    %59 = arith.cmpi eq, %1, %58 : vector<8x128xi32>
    %60 = arith.extui %59 : vector<8x128xi1> to vector<8x128xi32>
    %61 = arith.sitofp %60 : vector<8x128xi32> to vector<8x128xf32>
    %c6 = arith.constant 6 : index
    %c0_20 = arith.constant 0 : index
    %c0_21 = arith.constant 0 : index
    %62 = vector.load %arg2[%c6, %c0_20, %c0_21] : memref<16x128x256xf32, #tpu.memory_space<vmem>>, vector<1x128x256xf32>
    %63 = vector.shape_cast %62 : vector<1x128x256xf32> to vector<128x256xf32>
    %cst_22 = arith.constant dense<0.000000e+00> : vector<8x256xf32>
    %64 = tpu.matmul %61, %63, %cst_22 {dimension_numbers = #tpu.dot_dimension_numbers<[1], [0], [0], [1], [0, 0, 1, 1], [], []>} : vector<8x128xf32>, vector<128x256xf32>, vector<8x256xf32> -> vector<8x256xf32>
    %65 = arith.addf %56, %64 : vector<8x256xf32>
    %66 = vector.extract_strided_slice %0 {offsets = [0, 7], sizes = [8, 1], strides = [1, 1]} : vector<8x16xi32> to vector<8x1xi32>
    %67 = vector.broadcast %66 : vector<8x1xi32> to vector<8x128xi32>
    %68 = arith.cmpi eq, %1, %67 : vector<8x128xi32>
    %69 = arith.extui %68 : vector<8x128xi1> to vector<8x128xi32>
    %70 = arith.sitofp %69 : vector<8x128xi32> to vector<8x128xf32>
    %c7 = arith.constant 7 : index
    %c0_23 = arith.constant 0 : index
    %c0_24 = arith.constant 0 : index
    %71 = vector.load %arg2[%c7, %c0_23, %c0_24] : memref<16x128x256xf32, #tpu.memory_space<vmem>>, vector<1x128x256xf32>
    %72 = vector.shape_cast %71 : vector<1x128x256xf32> to vector<128x256xf32>
    %cst_25 = arith.constant dense<0.000000e+00> : vector<8x256xf32>
    %73 = tpu.matmul %70, %72, %cst_25 {dimension_numbers = #tpu.dot_dimension_numbers<[1], [0], [0], [1], [0, 0, 1, 1], [], []>} : vector<8x128xf32>, vector<128x256xf32>, vector<8x256xf32> -> vector<8x256xf32>
    %74 = arith.addf %65, %73 : vector<8x256xf32>
    %75 = vector.extract_strided_slice %0 {offsets = [0, 8], sizes = [8, 1], strides = [1, 1]} : vector<8x16xi32> to vector<8x1xi32>
    %76 = vector.broadcast %75 : vector<8x1xi32> to vector<8x128xi32>
    %77 = arith.cmpi eq, %1, %76 : vector<8x128xi32>
    %78 = arith.extui %77 : vector<8x128xi1> to vector<8x128xi32>
    %79 = arith.sitofp %78 : vector<8x128xi32> to vector<8x128xf32>
    %c8 = arith.constant 8 : index
    %c0_26 = arith.constant 0 : index
    %c0_27 = arith.constant 0 : index
    %80 = vector.load %arg2[%c8, %c0_26, %c0_27] : memref<16x128x256xf32, #tpu.memory_space<vmem>>, vector<1x128x256xf32>
    %81 = vector.shape_cast %80 : vector<1x128x256xf32> to vector<128x256xf32>
    %cst_28 = arith.constant dense<0.000000e+00> : vector<8x256xf32>
    %82 = tpu.matmul %79, %81, %cst_28 {dimension_numbers = #tpu.dot_dimension_numbers<[1], [0], [0], [1], [0, 0, 1, 1], [], []>} : vector<8x128xf32>, vector<128x256xf32>, vector<8x256xf32> -> vector<8x256xf32>
    %83 = arith.addf %74, %82 : vector<8x256xf32>
    %84 = vector.extract_strided_slice %0 {offsets = [0, 9], sizes = [8, 1], strides = [1, 1]} : vector<8x16xi32> to vector<8x1xi32>
    %85 = vector.broadcast %84 : vector<8x1xi32> to vector<8x128xi32>
    %86 = arith.cmpi eq, %1, %85 : vector<8x128xi32>
    %87 = arith.extui %86 : vector<8x128xi1> to vector<8x128xi32>
    %88 = arith.sitofp %87 : vector<8x128xi32> to vector<8x128xf32>
    %c9 = arith.constant 9 : index
    %c0_29 = arith.constant 0 : index
    %c0_30 = arith.constant 0 : index
    %89 = vector.load %arg2[%c9, %c0_29, %c0_30] : memref<16x128x256xf32, #tpu.memory_space<vmem>>, vector<1x128x256xf32>
    %90 = vector.shape_cast %89 : vector<1x128x256xf32> to vector<128x256xf32>
    %cst_31 = arith.constant dense<0.000000e+00> : vector<8x256xf32>
    %91 = tpu.matmul %88, %90, %cst_31 {dimension_numbers = #tpu.dot_dimension_numbers<[1], [0], [0], [1], [0, 0, 1, 1], [], []>} : vector<8x128xf32>, vector<128x256xf32>, vector<8x256xf32> -> vector<8x256xf32>
    %92 = arith.addf %83, %91 : vector<8x256xf32>
    %93 = vector.extract_strided_slice %0 {offsets = [0, 10], sizes = [8, 1], strides = [1, 1]} : vector<8x16xi32> to vector<8x1xi32>
    %94 = vector.broadcast %93 : vector<8x1xi32> to vector<8x128xi32>
    %95 = arith.cmpi eq, %1, %94 : vector<8x128xi32>
    %96 = arith.extui %95 : vector<8x128xi1> to vector<8x128xi32>
    %97 = arith.sitofp %96 : vector<8x128xi32> to vector<8x128xf32>
    %c10 = arith.constant 10 : index
    %c0_32 = arith.constant 0 : index
    %c0_33 = arith.constant 0 : index
    %98 = vector.load %arg2[%c10, %c0_32, %c0_33] : memref<16x128x256xf32, #tpu.memory_space<vmem>>, vector<1x128x256xf32>
    %99 = vector.shape_cast %98 : vector<1x128x256xf32> to vector<128x256xf32>
    %cst_34 = arith.constant dense<0.000000e+00> : vector<8x256xf32>
    %100 = tpu.matmul %97, %99, %cst_34 {dimension_numbers = #tpu.dot_dimension_numbers<[1], [0], [0], [1], [0, 0, 1, 1], [], []>} : vector<8x128xf32>, vector<128x256xf32>, vector<8x256xf32> -> vector<8x256xf32>
    %101 = arith.addf %92, %100 : vector<8x256xf32>
    %102 = vector.extract_strided_slice %0 {offsets = [0, 11], sizes = [8, 1], strides = [1, 1]} : vector<8x16xi32> to vector<8x1xi32>
    %103 = vector.broadcast %102 : vector<8x1xi32> to vector<8x128xi32>
    %104 = arith.cmpi eq, %1, %103 : vector<8x128xi32>
    %105 = arith.extui %104 : vector<8x128xi1> to vector<8x128xi32>
    %106 = arith.sitofp %105 : vector<8x128xi32> to vector<8x128xf32>
    %c11 = arith.constant 11 : index
    %c0_35 = arith.constant 0 : index
    %c0_36 = arith.constant 0 : index
    %107 = vector.load %arg2[%c11, %c0_35, %c0_36] : memref<16x128x256xf32, #tpu.memory_space<vmem>>, vector<1x128x256xf32>
    %108 = vector.shape_cast %107 : vector<1x128x256xf32> to vector<128x256xf32>
    %cst_37 = arith.constant dense<0.000000e+00> : vector<8x256xf32>
    %109 = tpu.matmul %106, %108, %cst_37 {dimension_numbers = #tpu.dot_dimension_numbers<[1], [0], [0], [1], [0, 0, 1, 1], [], []>} : vector<8x128xf32>, vector<128x256xf32>, vector<8x256xf32> -> vector<8x256xf32>
    %110 = arith.addf %101, %109 : vector<8x256xf32>
    %111 = vector.extract_strided_slice %0 {offsets = [0, 12], sizes = [8, 1], strides = [1, 1]} : vector<8x16xi32> to vector<8x1xi32>
    %112 = vector.broadcast %111 : vector<8x1xi32> to vector<8x128xi32>
    %113 = arith.cmpi eq, %1, %112 : vector<8x128xi32>
    %114 = arith.extui %113 : vector<8x128xi1> to vector<8x128xi32>
    %115 = arith.sitofp %114 : vector<8x128xi32> to vector<8x128xf32>
    %c12 = arith.constant 12 : index
    %c0_38 = arith.constant 0 : index
    %c0_39 = arith.constant 0 : index
    %116 = vector.load %arg2[%c12, %c0_38, %c0_39] : memref<16x128x256xf32, #tpu.memory_space<vmem>>, vector<1x128x256xf32>
    %117 = vector.shape_cast %116 : vector<1x128x256xf32> to vector<128x256xf32>
    %cst_40 = arith.constant dense<0.000000e+00> : vector<8x256xf32>
    %118 = tpu.matmul %115, %117, %cst_40 {dimension_numbers = #tpu.dot_dimension_numbers<[1], [0], [0], [1], [0, 0, 1, 1], [], []>} : vector<8x128xf32>, vector<128x256xf32>, vector<8x256xf32> -> vector<8x256xf32>
    %119 = arith.addf %110, %118 : vector<8x256xf32>
    %120 = vector.extract_strided_slice %0 {offsets = [0, 13], sizes = [8, 1], strides = [1, 1]} : vector<8x16xi32> to vector<8x1xi32>
    %121 = vector.broadcast %120 : vector<8x1xi32> to vector<8x128xi32>
    %122 = arith.cmpi eq, %1, %121 : vector<8x128xi32>
    %123 = arith.extui %122 : vector<8x128xi1> to vector<8x128xi32>
    %124 = arith.sitofp %123 : vector<8x128xi32> to vector<8x128xf32>
    %c13 = arith.constant 13 : index
    %c0_41 = arith.constant 0 : index
    %c0_42 = arith.constant 0 : index
    %125 = vector.load %arg2[%c13, %c0_41, %c0_42] : memref<16x128x256xf32, #tpu.memory_space<vmem>>, vector<1x128x256xf32>
    %126 = vector.shape_cast %125 : vector<1x128x256xf32> to vector<128x256xf32>
    %cst_43 = arith.constant dense<0.000000e+00> : vector<8x256xf32>
    %127 = tpu.matmul %124, %126, %cst_43 {dimension_numbers = #tpu.dot_dimension_numbers<[1], [0], [0], [1], [0, 0, 1, 1], [], []>} : vector<8x128xf32>, vector<128x256xf32>, vector<8x256xf32> -> vector<8x256xf32>
    %128 = arith.addf %119, %127 : vector<8x256xf32>
    %129 = vector.extract_strided_slice %0 {offsets = [0, 14], sizes = [8, 1], strides = [1, 1]} : vector<8x16xi32> to vector<8x1xi32>
    %130 = vector.broadcast %129 : vector<8x1xi32> to vector<8x128xi32>
    %131 = arith.cmpi eq, %1, %130 : vector<8x128xi32>
    %132 = arith.extui %131 : vector<8x128xi1> to vector<8x128xi32>
    %133 = arith.sitofp %132 : vector<8x128xi32> to vector<8x128xf32>
    %c14 = arith.constant 14 : index
    %c0_44 = arith.constant 0 : index
    %c0_45 = arith.constant 0 : index
    %134 = vector.load %arg2[%c14, %c0_44, %c0_45] : memref<16x128x256xf32, #tpu.memory_space<vmem>>, vector<1x128x256xf32>
    %135 = vector.shape_cast %134 : vector<1x128x256xf32> to vector<128x256xf32>
    %cst_46 = arith.constant dense<0.000000e+00> : vector<8x256xf32>
    %136 = tpu.matmul %133, %135, %cst_46 {dimension_numbers = #tpu.dot_dimension_numbers<[1], [0], [0], [1], [0, 0, 1, 1], [], []>} : vector<8x128xf32>, vector<128x256xf32>, vector<8x256xf32> -> vector<8x256xf32>
    %137 = arith.addf %128, %136 : vector<8x256xf32>
    %138 = vector.extract_strided_slice %0 {offsets = [0, 15], sizes = [8, 1], strides = [1, 1]} : vector<8x16xi32> to vector<8x1xi32>
    %139 = vector.broadcast %138 : vector<8x1xi32> to vector<8x128xi32>
    %140 = arith.cmpi eq, %1, %139 : vector<8x128xi32>
    %141 = arith.extui %140 : vector<8x128xi1> to vector<8x128xi32>
    %142 = arith.sitofp %141 : vector<8x128xi32> to vector<8x128xf32>
    %c15 = arith.constant 15 : index
    %c0_47 = arith.constant 0 : index
    %c0_48 = arith.constant 0 : index
    %143 = vector.load %arg2[%c15, %c0_47, %c0_48] : memref<16x128x256xf32, #tpu.memory_space<vmem>>, vector<1x128x256xf32>
    %144 = vector.shape_cast %143 : vector<1x128x256xf32> to vector<128x256xf32>
    %cst_49 = arith.constant dense<0.000000e+00> : vector<8x256xf32>
    %145 = tpu.matmul %142, %144, %cst_49 {dimension_numbers = #tpu.dot_dimension_numbers<[1], [0], [0], [1], [0, 0, 1, 1], [], []>} : vector<8x128xf32>, vector<128x256xf32>, vector<8x256xf32> -> vector<8x256xf32>
    %146 = arith.addf %137, %145 : vector<8x256xf32>
    %c0_50 = arith.constant 0 : index
    %c0_51 = arith.constant 0 : index
    %147 = vector.load %arg3[%c0_50, %c0_51] : memref<1x256xf32, #tpu.memory_space<vmem>>, vector<1x256xf32>
    %148 = vector.broadcast %147 : vector<1x256xf32> to vector<8x256xf32>
    %149 = arith.addf %146, %148 : vector<8x256xf32>
    %cst_52 = arith.constant 0.000000e+00 : f32
    %150 = vector.broadcast %cst_52 : f32 to vector<8x256xf32>
    %151 = arith.cmpf ogt, %149, %150 : vector<8x256xf32>
    %cst_53 = arith.constant 0.00999999977 : f32
    %152 = vector.broadcast %cst_53 : f32 to vector<8x256xf32>
    %153 = arith.mulf %152, %149 : vector<8x256xf32>
    %154 = arith.select %151, %149, %153 : vector<8x256xi1>, vector<8x256xf32>
    %c0_54 = arith.constant 0 : index
    %c0_55 = arith.constant 0 : index
    %155 = vector.load %arg4[%c0_54, %c0_55] : memref<256x128xf32, #tpu.memory_space<vmem>>, vector<256x128xf32>
    %cst_56 = arith.constant dense<0.000000e+00> : vector<8x128xf32>
    %156 = tpu.matmul %154, %155, %cst_56 {dimension_numbers = #tpu.dot_dimension_numbers<[1], [0], [0], [1], [0, 0, 1, 1], [], []>} : vector<8x256xf32>, vector<256x128xf32>, vector<8x128xf32> -> vector<8x128xf32>
    %c0_57 = arith.constant 0 : index
    %c0_58 = arith.constant 0 : index
    %157 = vector.load %arg5[%c0_57, %c0_58] : memref<1x128xf32, #tpu.memory_space<vmem>>, vector<1x128xf32>
    %158 = vector.broadcast %157 : vector<1x128xf32> to vector<8x128xf32>
    %159 = arith.addf %156, %158 : vector<8x128xf32>
    %c0_59 = arith.constant 0 : index
    %c0_60 = arith.constant 0 : index
    %160 = vector.load %arg6[%c0_59, %c0_60] : memref<8x128xf32, #tpu.memory_space<vmem>>, vector<8x128xf32>
    tpu.vector_store %arg6[%c0_59, %c0_60], %159 {strides = array<i32>} : memref<8x128xf32, #tpu.memory_space<vmem>>, vector<8x128xf32>,
    return
  }
  func.func @transform_0(%arg0: i32) -> (i32, i32) {
    %c0_i32 = arith.constant 0 : i32
    %c0_i32_0 = arith.constant 0 : i32
    return %arg0, %c0_i32 : i32, i32
  }
  func.func @transform_1(%arg0: i32) -> (i32, i32, i32) {
    %c0_i32 = arith.constant 0 : i32
    %c0_i32_0 = arith.constant 0 : i32
    %c0_i32_1 = arith.constant 0 : i32
    %c0_i32_2 = arith.constant 0 : i32
    return %c0_i32, %c0_i32_0, %c0_i32_1 : i32, i32, i32
  }
  func.func @transform_2(%arg0: i32) -> (i32, i32) {
    %c0_i32 = arith.constant 0 : i32
    %c0_i32_0 = arith.constant 0 : i32
    %c0_i32_1 = arith.constant 0 : i32
    return %c0_i32, %c0_i32_0 : i32, i32
  }
  func.func @transform_3(%arg0: i32) -> (i32, i32) {
    %c0_i32 = arith.constant 0 : i32
    %c0_i32_0 = arith.constant 0 : i32
    %c0_i32_1 = arith.constant 0 : i32
    return %c0_i32, %c0_i32_0 : i32, i32
  }
  func.func @transform_4(%arg0: i32) -> (i32, i32) {
    %c0_i32 = arith.constant 0 : i32
    %c0_i32_0 = arith.constant 0 : i32
    %c0_i32_1 = arith.constant 0 : i32
    return %c0_i32, %c0_i32_0 : i32, i32
  }
  func.func @transform_5(%arg0: i32) -> (i32, i32) {
    %c0_i32 = arith.constant 0 : i32
    %c0_i32_0 = arith.constant 0 : i32
    return %arg0, %c0_i32 : i32, i32
  }
}

</mosaic_0001>

<bundles_post_ra>
// kernel: tpu_custom_call.1
= control target key start
LH: loop header
LB: loop body
LE: loop exit
PB: predicated region body
PF: predicated region fallthrough
CT: control target
= control target key end

     0   :  { %10 = vsyncpa [#allocation3], 0  ;;  %s3067_s0 = inlined_call_operand.hbm [shape: s32[8,16], index: 0, kind: input, shape index: {}]   ;;  %s3068_s1 = inlined_call_operand.hbm [shape: f32[16,128,256], index: 1, kind: input, shape index: {}]   ;;  %s3069_s2 = inlined_call_operand.hbm [shape: f32[1,256], index: 2, kind: input, shape index: {}]   ;;  %s3070_s3 = inlined_call_operand.hbm [shape: f32[256,128], index: 3, kind: input, shape index: {}]   ;;  %s3071_s4 = inlined_call_operand.hbm [shape: f32[1,128], index: 4, kind: input, shape index: {}]   ;;  %s3072_s5 = inlined_call_operand.hbm [shape: f32[8,128], index: 5, kind: output, shape index: {}]  }
   0x1   :  { %11 = vsyncpa [#allocation6], 0 }
   0x2   :  { %12 = vsyncpa [#allocation9], 0 }
   0x3   :  { %13 = vsyncpa [#allocation4], 0  ;;  %s2847_s18 = smov [#allocation5]   ;;  %s2707_s22 = scalar_lea.hbm %s3068_s1, 65536 }
   0x4   :  { %s29_s19 = sshll.u32 %s2847_s18, 4  ;;  %p2708_p0 = scmp.ne.s32.totalorder %s3068_s1, %s2707_s22  ;;  %s30_s19 = int_to_ptr.vmem [resolvable:$true] %s29_s19 }
   0x5   :  { %p2711_p1 = scmp.lt.u32.totalorder %s2707_s22, %s3068_s1 }
   0x7   :  { %p2713_p2 = pnand %p2711_p1, %p2708_p0 }
   0x9   :  { %2716 = shalt.err (!%p2713_p2)
}
   0xa   :  { %s2717_s27 = scalar_lea.vmem %s30_s19, 65536  ;;  %p2722_p4 = scmp.lt.s32.totalorder %s30_s19, %s30_s19 }
   0xb   :  { %p2718_p3 = scmp.ne.s32.totalorder %s30_s19, %s2717_s27  ;;  %p2723_p5 = scmp.lt.s32.totalorder %s2717_s27, %s2717_s27 }
   0xd   :  { %p2724_p6 = por %p2723_p5, %p2722_p4 }
   0xf   :  { %p2725_p7 = pnand %p2724_p6, %p2718_p3 }
  0x11   :  { %2728 = shalt.err (!%p2725_p7)
}
  0x12   :  { %s2848_s28 = smov 256   ;;  %s2849_s29 = smov 16  }
  0x13   :  { %35 = dma.hbm_to_vmem [thread:$0]  %s3068_s1, 65536, %s30_s19, [#allocation6], %s2848_s28, %s2848_s28, %s2849_s29  }
  0x14   :  { %s2850_s7 = smov [#allocation8]   ;;  %s2729_s11 = scalar_lea.hbm %s3070_s3, 4096 }
  0x15   :  { %s51_s8 = sshll.u32 %s2850_s7, 4  ;;  %p2730_p8 = scmp.ne.s32.totalorder %s3070_s3, %s2729_s11  ;;  %s52_s8 = int_to_ptr.vmem [resolvable:$true] %s51_s8 }
  0x16   :  { %p2733_p9 = scmp.lt.u32.totalorder %s2729_s11, %s3070_s3 }
  0x18   :  { %p2735_p10 = pnand %p2733_p9, %p2730_p8 }
  0x1a   :  { %2738 = shalt.err (!%p2735_p10)
}
  0x1b   :  { %s2739_s16 = scalar_lea.vmem %s52_s8, 4096  ;;  %p2744_p12 = scmp.lt.s32.totalorder %s52_s8, %s52_s8 }
  0x1c   :  { %p2740_p11 = scmp.ne.s32.totalorder %s52_s8, %s2739_s16  ;;  %p2745_p13 = scmp.lt.s32.totalorder %s2739_s16, %s2739_s16 }
  0x1e   :  { %p2746_p0 = por %p2745_p13, %p2744_p12 }
  0x20   :  { %p2747_p1 = pnand %p2746_p0, %p2740_p11 }
  0x22   :  { %2750 = shalt.err (!%p2747_p1)
}
  0x23   :  { %s2851_s1 = smov 128   ;;  %s2852_s17 = smov 8  }
  0x24   :  { %57 = dma.hbm_to_vmem [thread:$0]  %s3070_s3, 4096, %s52_s8, [#allocation9], %s2851_s1, %s2851_s1, %s2852_s17  }
  0x25   :  { %s2853_s20 = smov [#allocation2]   ;;  %s2854_s22 = smov [#allocation7]  }
  0x26   :  { %s20_s21 = sshll.u32 %s2853_s20, 4  ;;  %s42_s23 = sshll.u32 %s2854_s22, 4  ;;  %s21_s21 = int_to_ptr.vmem [resolvable:$true] %s20_s21  ;;  %s43_s23 = int_to_ptr.vmem [resolvable:$true] %s42_s23 }
  0x27   :  { %s2751_s26 = scalar_lea.hbm %s3067_s0, 128 }
  0x28   :  { %p2752_p2 = scmp.ne.s32.totalorder %s3067_s0, %s2751_s26  ;;  %p2755_p3 = scmp.lt.u32.totalorder %s2751_s26, %s3067_s0 }
  0x2a   :  { %p2757_p4 = pnand %p2755_p3, %p2752_p2 }
  0x2c   :  { %2760 = shalt.err (!%p2757_p4)
}
  0x2d   :  { %s2761_s3 = scalar_lea.vmem %s21_s21, 128  ;;  %p2766_p6 = scmp.lt.s32.totalorder %s21_s21, %s21_s21 }
  0x2e   :  { %p2762_p5 = scmp.ne.s32.totalorder %s21_s21, %s2761_s3  ;;  %p2767_p7 = scmp.lt.s32.totalorder %s2761_s3, %s2761_s3 }
  0x30   :  { %p2768_p8 = por %p2767_p7, %p2766_p6 }
  0x32   :  { %p2769_p9 = pnand %p2768_p8, %p2762_p5 }
  0x34   :  { %2772 = shalt.err (!%p2769_p9)
}
  0x35   :  { %23 = dma.hbm_to_vmem [thread:$0]  %s3067_s0, 128, %s21_s21, [#allocation3]  }
  0x36   :  { %s2773_s10 = scalar_lea.hbm %s3069_s2, 32 }
  0x37   :  { %p2774_p10 = scmp.ne.s32.totalorder %s3069_s2, %s2773_s10  ;;  %p2777_p11 = scmp.lt.u32.totalorder %s2773_s10, %s3069_s2 }
  0x39   :  { %p2779_p12 = pnand %p2777_p11, %p2774_p10 }
  0x3b   :  { %2782 = shalt.err (!%p2779_p12)
}
  0x3c   :  { %s2783_s15 = scalar_lea.vmem %s43_s23, 32  ;;  %p2788_p0 = scmp.lt.s32.totalorder %s43_s23, %s43_s23 }
  0x3d   :  { %p2784_p13 = scmp.ne.s32.totalorder %s43_s23, %s2783_s15  ;;  %p2789_p1 = scmp.lt.s32.totalorder %s2783_s15, %s2783_s15 }
  0x3f   :  { %p2790_p2 = por %p2789_p1, %p2788_p0 }
  0x41   :  { %p2791_p3 = pnand %p2790_p2, %p2784_p13 }
  0x43   :  { %2794 = shalt.err (!%p2791_p3)
}
  0x44   :  { %45 = dma.hbm_to_vmem [thread:$0]  %s3069_s2, 32, %s43_s23, [#allocation6]  }
  0x45   :  { %s2855_s1 = smov [#allocation10]   ;;  %s2795_s20 = scalar_lea.hbm %s3071_s4, 16 }
  0x46   :  { %s64_s17 = sshll.u32 %s2855_s1, 4  ;;  %p2796_p4 = scmp.ne.s32.totalorder %s3071_s4, %s2795_s20  ;;  %s65_s17 = int_to_ptr.vmem [resolvable:$true] %s64_s17 }
  0x47   :  { %p2799_p5 = scmp.lt.u32.totalorder %s2795_s20, %s3071_s4 }
  0x49   :  { %p2801_p6 = pnand %p2799_p5, %p2796_p4 }
  0x4b   :  { %2804 = shalt.err (!%p2801_p6)
}
  0x4c   :  { %s2805_s26 = scalar_lea.vmem %s65_s17, 16  ;;  %s2809_s2 = scalar_lea.vmem %s65_s17, 32 }
  0x4d   :  { %p2806_p7 = scmp.ne.s32.totalorder %s65_s17, %s2805_s26  ;;  %p2810_p8 = scmp.lt.s32.totalorder %s65_s17, %s65_s17 }
  0x4e   :  { %p2811_p9 = scmp.lt.s32.totalorder %s2809_s2, %s2805_s26 }
  0x50   :  { %p2812_p10 = por %p2811_p9, %p2810_p8 }
  0x52   :  { %p2813_p11 = pnand %p2812_p10, %p2806_p7 }
  0x54   :  { %2816 = shalt.err (!%p2813_p11)
}
  0x55   :  { %67 = dma.hbm_to_vmem [thread:$0]  %s3071_s4, 16, %s65_s17, [#allocation9]  }
  0x56   :  { %2839 = dma.done.wait [#allocation3], 128  }
  0x57   :  { %2840 = vsyncadd [#allocation3], 4294967168 }
  0x58   :  { %2841 = dma.done.wait [#allocation6], 65568  }
  0x59   :  { %2842 = vsyncadd [#allocation6], 4294901728 }
  0x5a   :  { %2843 = dma.done.wait [#allocation9], 4112  }
  0x5b   :  { %2844 = vsyncadd [#allocation9], 4294963184  ;;  %v2856_v0 = vmov 7   ;;  %v2857_v1 = vmov 1   ;;  %v2965_v2 = vld [vmem:[#allocation2] sm:$0xff]  ;;  %v132_v3 = vld [vmem:[#allocation5 + $0x108] sm:$0xff] }
  0x5c   :  { %2690 = vset.pattern.permute.xlu0 %v2856_v0  ;;  %2692 = vset.pattern.permute.xlu1 %v2857_v1  ;;  %v134_v4 = vld [vmem:[#allocation5 + $0x118] sm:$0xff]  ;;  %v873_v6 = vld [vmem:[#allocation5 + $0x708] sm:$0xff]  ;;  %v131_v8 = vld [vmem:[#allocation5 + $0x100] sm:$0xff]  ;;  %v2858_v13 = vmov 0.0   ;;  %v2859_v23 = vmov 9   ;;  %v2860_v24 = vmov 8  }
  0x5d   :  { %125 = vperm.xlu1 %2692, %v2965_v2   ;;  %866 = vperm.xlu0 %2690, %v2965_v2   ;;  %v2088_v5 = vpack.c.bf16 %v134_v4, %v132_v3  ;;  %v875_v7 = vld [vmem:[#allocation5 + $0x718] sm:$0xff]  ;;  %v133_v10 = vld [vmem:[#allocation5 + $0x110] sm:$0xff]  ;;  %v872_v11 = vld [vmem:[#allocation5 + $0x700] sm:$0xff]  ;;  %v2861_v38 = vmov 0   ;;  %v2862_v39 = vmov 10   ;;  %v2863_v55 = vmov 2  }
  0x5e   :  { %v2312_v9 = vpack.c.bf16 %v875_v7, %v873_v6  ;;  %v874_v12 = vld [vmem:[#allocation5 + $0x710] sm:$0xff]  ;;  %227 = vmatprep.mubr.f32.mxu1 %v2858_v13  ;;  %968 = vmatprep.mubr.f32.mxu0 %v2858_v13  ;;  %v2090_v14 = vpack.c.bf16 %v133_v10, %v131_v8  ;;  %v136_v16 = vld [vmem:[#allocation5 + $0x128] sm:$0xff]  ;;  %v138_v17 = vld [vmem:[#allocation5 + $0x138] sm:$0xff]  ;;  %v2864_v56 = vmov 3   ;;  %s2874_s4 = smov [#allocation11]  }
  0x5f   :  { %2089 = vmatprep.subr.bf16.mxu1 %v2088_v5  ;;  %v2314_v15 = vpack.c.bf16 %v874_v12, %v872_v11  ;;  %v877_v18 = vld [vmem:[#allocation5 + $0x728] sm:$0xff]  ;;  %v2092_v19 = vpack.c.bf16 %v138_v17, %v136_v16  ;;  %v879_v20 = vld [vmem:[#allocation5 + $0x738] sm:$0xff]  ;;  %v135_v21 = vld [vmem:[#allocation5 + $0x120] sm:$0xff]  ;;  %s2009_s28 = sshll.u32 %s2874_s4, 4  ;;  %s2010_s28 = int_to_ptr.vmem [resolvable:$true] %s2009_s28 }
  0x60   :  { %2313 = vmatprep.subr.bf16.mxu0 %v2312_v9  ;;  %v137_v22 = vld [vmem:[#allocation5 + $0x130] sm:$0xff]  ;;  %v2316_v25 = vpack.c.bf16 %v879_v20, %v877_v18  ;;  %v876_v26 = vld [vmem:[#allocation5 + $0x720] sm:$0xff]  ;;  %v140_v28 = vld [vmem:[#allocation5 + $0x148] sm:$0xff]  ;;  %2091 = vmatpush1.bf16.msra.mxu1 %v2090_v14  ;;  %v2865_v9 = vmov 11   ;;  %s2817_s29 = scalar_lea.vmem %s2010_s28, 128  ;;  %p2822_p13 = scmp.lt.s32.totalorder %s2010_s28, %s2010_s28 }
  0x61   :  { %2693 = vset.pattern.permute.xlu1 %v2859_v23  ;;  %2691 = vset.pattern.permute.xlu0 %v2860_v24  ;;  %v878_v27 = vld [vmem:[#allocation5 + $0x730] sm:$0xff]  ;;  %v142_v29 = vld [vmem:[#allocation5 + $0x158] sm:$0xff]  ;;  %v881_v30 = vld [vmem:[#allocation5 + $0x748] sm:$0xff]  ;;  %v2094_v32 = vpack.c.bf16 %v137_v22, %v135_v21  ;;  %p2818_p12 = scmp.ne.s32.totalorder %s2010_s28, %s2817_s29  ;;  %p2823_p0 = scmp.lt.s32.totalorder %s2817_s29, %s2817_s29 }
  0x62   :  { %1090 = vperm.xlu1 %2693, %v2965_v2   ;;  %978 = vperm.xlu0 %2691, %v2965_v2   ;;  %v883_v31 = vld [vmem:[#allocation5 + $0x758] sm:$0xff]  ;;  %v2318_v33 = vpack.c.bf16 %v878_v27, %v876_v26  ;;  %v2096_v34 = vpack.c.bf16 %v142_v29, %v140_v28  ;;  %v139_v36 = vld [vmem:[#allocation5 + $0x140] sm:$0xff]  ;;  %v141_v37 = vld [vmem:[#allocation5 + $0x150] sm:$0xff] }
  0x63   :  { %2315 = vmatpush1.bf16.msra.mxu0 %v2314_v15  ;;  %2093 = vmatprep.subr.bf16.mxu1 %v2092_v19  ;;  %v2320_v35 = vpack.c.bf16 %v883_v31, %v881_v30  ;;  %v880_v40 = vld [vmem:[#allocation5 + $0x740] sm:$0xff]  ;;  %v882_v41 = vld [vmem:[#allocation5 + $0x750] sm:$0xff]  ;;  %v144_v42 = vld [vmem:[#allocation5 + $0x168] sm:$0xff]  ;;  %v2098_v46 = vpack.c.bf16 %v141_v37, %v139_v36  ;;  %p2824_p1 = por %p2823_p0, %p2822_p13 }
  0x64   :  { %2317 = vmatprep.subr.bf16.mxu0 %v2316_v25  ;;  %v146_v43 = vld [vmem:[#allocation5 + $0x178] sm:$0xff]  ;;  %v885_v44 = vld [vmem:[#allocation5 + $0x768] sm:$0xff]  ;;  %2095 = vmatpush1.bf16.msra.mxu1 %v2094_v32  ;;  %v2322_v47 = vpack.c.bf16 %v882_v41, %v880_v40  ;;  %v143_v48 = vld [vmem:[#allocation5 + $0x160] sm:$0xff]  ;;  %v2866_v32 = vmov 12  }
  0x65   :  { %v887_v45 = vld [vmem:[#allocation5 + $0x778] sm:$0xff]  ;;  %2097 = vmatprep.subr.bf16.mxu1 %v2096_v34  ;;  %v145_v49 = vld [vmem:[#allocation5 + $0x170] sm:$0xff]  ;;  %v2100_v50 = vpack.c.bf16 %v146_v43, %v144_v42  ;;  %v884_v52 = vld [vmem:[#allocation5 + $0x760] sm:$0xff]  ;;  %p2825_p2 = pnand %p2824_p1, %p2818_p12 }
  0x66   :  { %2694 = vset.pattern.permute.xlu1 %v2861_v38  ;;  %2695 = vset.pattern.permute.xlu0 %v2862_v39  ;;  %v2324_v51 = vpack.c.bf16 %v887_v45, %v885_v44  ;;  %v886_v53 = vld [vmem:[#allocation5 + $0x770] sm:$0xff]  ;;  %v148_v54 = vld [vmem:[#allocation5 + $0x188] sm:$0xff]  ;;  %v150_v57 = vld [vmem:[#allocation5 + $0x198] sm:$0xff]  ;;  %v2102_v60 = vpack.c.bf16 %v145_v49, %v143_v48  ;;  %v2867_v48 = vmov 4  }
  0x67   :  { %87 = vperm.xlu1 %2694, %v2965_v2   ;;  %1202 = vperm.xlu0 %2695, %v2965_v2   ;;  %v889_v58 = vld [vmem:[#allocation5 + $0x788] sm:$0xff]  ;;  %v891_v59 = vld [vmem:[#allocation5 + $0x798] sm:$0xff]  ;;  %v2326_v61 = vpack.c.bf16 %v886_v53, %v884_v52  ;;  %v147_v62 = vld [vmem:[#allocation5 + $0x180] sm:$0xff]  ;;  %v2104_v0 = vpack.c.bf16 %v150_v57, %v148_v54  ;;  %v2868_v53 = vmov 5   ;;  %v2869_v54 = vmov 13  }
  0x68   :  { %2319 = vmatpush1.bf16.msra.mxu0 %v2318_v33  ;;  %2099 = vmatpush1.bf16.msra.mxu1 %v2098_v46  ;;  %v149_v63 = vld [vmem:[#allocation5 + $0x190] sm:$0xff]  ;;  %v2328_v1 = vpack.c.bf16 %v891_v59, %v889_v58  ;;  %v888_v3 = vld [vmem:[#allocation5 + $0x780] sm:$0xff]  ;;  %v152_v5 = vld [vmem:[#allocation5 + $0x1a8] sm:$0xff]  ;;  %v84_v57 = vlaneseq }
  0x69   :  { %2321 = vmatprep.subr.bf16.mxu0 %v2320_v35  ;;  %2101 = vmatprep.subr.bf16.mxu1 %v2100_v50  ;;  %v890_v4 = vld [vmem:[#allocation5 + $0x790] sm:$0xff]  ;;  %v154_v6 = vld [vmem:[#allocation5 + $0x1b8] sm:$0xff]  ;;  %v893_v7 = vld [vmem:[#allocation5 + $0x7a8] sm:$0xff]  ;;  %v2106_v10 = vpack.c.bf16 %v149_v63, %v147_v62 }
  0x6a   :  { %v895_v8 = vld [vmem:[#allocation5 + $0x7b8] sm:$0xff]  ;;  %v2330_v11 = vpack.c.bf16 %v890_v4, %v888_v3  ;;  %v151_v12 = vld [vmem:[#allocation5 + $0x1a0] sm:$0xff]  ;;  %v153_v14 = vld [vmem:[#allocation5 + $0x1b0] sm:$0xff]  ;;  %v2108_v15 = vpack.c.bf16 %v154_v6, %v152_v5  ;;  %v2985_v63 = vand.u32 127, %v84_v57 }
  0x6b   :  { %2696 = vset.pattern.permute.xlu1 %v2863_v55  ;;  %2698 = vset.pattern.permute.xlu0 %v2864_v56  ;;  %v2332_v16 = vpack.c.bf16 %v895_v8, %v893_v7  ;;  %v892_v17 = vld [vmem:[#allocation5 + $0x7a0] sm:$0xff]  ;;  %v894_v18 = vld [vmem:[#allocation5 + $0x7b0] sm:$0xff]  ;;  %v156_v19 = vld [vmem:[#allocation5 + $0x1c8] sm:$0xff]  ;;  %v2110_v23 = vpack.c.bf16 %v153_v14, %v151_v12  ;;  %v2870_v55 = vmov 6   ;;  %v2871_v56 = vmov 14  }
  0x6c   :  { %306 = vperm.xlu1 %2696, %v2965_v2   ;;  %418 = vperm.xlu0 %2698, %v2965_v2   ;;  %v158_v20 = vld [vmem:[#allocation5 + $0x1d8] sm:$0xff]  ;;  %v897_v21 = vld [vmem:[#allocation5 + $0x7c8] sm:$0xff]  ;;  %v2334_v24 = vpack.c.bf16 %v894_v18, %v892_v17  ;;  %v155_v25 = vld [vmem:[#allocation5 + $0x1c0] sm:$0xff] }
  0x6d   :  { %2323 = vmatpush1.bf16.msra.mxu0 %v2322_v47  ;;  %2103 = vmatpush1.bf16.msra.mxu1 %v2102_v60  ;;  %v899_v22 = vld [vmem:[#allocation5 + $0x7d8] sm:$0xff]  ;;  %v157_v26 = vld [vmem:[#allocation5 + $0x1d0] sm:$0xff]  ;;  %v2112_v27 = vpack.c.bf16 %v158_v20, %v156_v19  ;;  %v896_v29 = vld [vmem:[#allocation5 + $0x7c0] sm:$0xff]  ;;  %v2873_v20 = vmov 1.0  }
  0x6e   :  { %2325 = vmatprep.subr.bf16.mxu0 %v2324_v51  ;;  %2105 = vmatprep.subr.bf16.mxu1 %v2104_v0  ;;  %v2336_v28 = vpack.c.bf16 %v899_v22, %v897_v21  ;;  %v898_v30 = vld [vmem:[#allocation5 + $0x7d0] sm:$0xff]  ;;  %v160_v31 = vld [vmem:[#allocation5 + $0x1e8] sm:$0xff]  ;;  %v162_v33 = vld [vmem:[#allocation5 + $0x1f8] sm:$0xff]  ;;  %v2114_v36 = vpack.c.bf16 %v157_v26, %v155_v25 }
  0x6f   :  { %v901_v34 = vld [vmem:[#allocation5 + $0x7e8] sm:$0xff]  ;;  %v903_v35 = vld [vmem:[#allocation5 + $0x7f8] sm:$0xff]  ;;  %v2338_v37 = vpack.c.bf16 %v898_v30, %v896_v29  ;;  %v159_v38 = vld [vmem:[#allocation5 + $0x1e0] sm:$0xff]  ;;  %v2116_v40 = vpack.c.bf16 %v162_v33, %v160_v31 }
  0x70   :  { %2697 = vset.pattern.permute.xlu1 %v2865_v9  ;;  %v161_v39 = vld [vmem:[#allocation5 + $0x1f0] sm:$0xff]  ;;  %v2340_v41 = vpack.c.bf16 %v903_v35, %v901_v34  ;;  %v900_v42 = vld [vmem:[#allocation5 + $0x7e0] sm:$0xff]  ;;  %v93_v44 = vld [vmem:[#allocation5 + $0x8] sm:$0xff]  ;;  %2701 = vset.pattern.permute.xlu0 %v2869_v54 }
  0x71   :  { %2327 = vmatpush1.bf16.msra.mxu0 %v2326_v61  ;;  %1314 = vperm.xlu1 %2697, %v2965_v2   ;;  %v902_v43 = vld [vmem:[#allocation5 + $0x7f0] sm:$0xff]  ;;  %v95_v45 = vld [vmem:[#allocation5 + $0x18] sm:$0xff]  ;;  %v985_v46 = vld [vmem:[#allocation5 + $0x808] sm:$0xff]  ;;  %v2118_v49 = vpack.c.bf16 %v161_v39, %v159_v38 }
  0x72   :  { %2329 = vmatprep.subr.bf16.mxu0 %v2328_v1  ;;  %2107 = vmatpush1.bf16.msra.mxu1 %v2106_v10  ;;  %v987_v47 = vld [vmem:[#allocation5 + $0x818] sm:$0xff]  ;;  %v2342_v50 = vpack.c.bf16 %v902_v43, %v900_v42  ;;  %v2120_v51 = vpack.c.bf16 %v95_v45, %v93_v44  ;;  %v92_v58 = vld [vmem:[#allocation5] sm:$0xff]  ;;  %v94_v59 = vld [vmem:[#allocation5 + $0x10] sm:$0xff] }
  0x73   :  { %2109 = vmatprep.subr.bf16.mxu1 %v2108_v15  ;;  %v2344_v52 = vpack.c.bf16 %v987_v47, %v985_v46  ;;  %1538 = vperm.xlu0 %2701, %v2965_v2   ;;  %v984_v60 = vld [vmem:[#allocation5 + $0x800] sm:$0xff]  ;;  %v986_v61 = vld [vmem:[#allocation5 + $0x810] sm:$0xff]  ;;  %v97_v62 = vld [vmem:[#allocation5 + $0x28] sm:$0xff]  ;;  %v2122_v4 = vpack.c.bf16 %v94_v59, %v92_v58 }
  0x74   :  { %v99_v0 = vld [vmem:[#allocation5 + $0x38] sm:$0xff]  ;;  %v989_v1 = vld [vmem:[#allocation5 + $0x828] sm:$0xff]  ;;  %v2346_v5 = vpack.c.bf16 %v986_v61, %v984_v60  ;;  %v96_v6 = vld [vmem:[#allocation5 + $0x20] sm:$0xff] }
  0x75   :  { %2331 = vmatpush1.bf16.msra.mxu0 %v2330_v11  ;;  %2699 = vset.pattern.permute.xlu1 %v2866_v32  ;;  %v991_v3 = vld [vmem:[#allocation5 + $0x838] sm:$0xff]  ;;  %v98_v7 = vld [vmem:[#allocation5 + $0x30] sm:$0xff]  ;;  %v2124_v10 = vpack.c.bf16 %v99_v0, %v97_v62  ;;  %v988_v12 = vld [vmem:[#allocation5 + $0x820] sm:$0xff] }
  0x76   :  { %2333 = vmatprep.subr.bf16.mxu0 %v2332_v16  ;;  %1426 = vperm.xlu1 %2699, %v2965_v2   ;;  %v2348_v11 = vpack.c.bf16 %v991_v3, %v989_v1  ;;  %v990_v14 = vld [vmem:[#allocation5 + $0x830] sm:$0xff]  ;;  %v101_v15 = vld [vmem:[#allocation5 + $0x48] sm:$0xff]  ;;  %v2872_v16 = vmov 15   ;;  %v103_v17 = vld [vmem:[#allocation5 + $0x58] sm:$0xff]  ;;  %v2126_v21 = vpack.c.bf16 %v98_v7, %v96_v6 }
  0x77   :  { %2111 = vmatpush1.bf16.msra.mxu1 %v2110_v23  ;;  %2704 = vset.pattern.permute.xlu0 %v2870_v55  ;;  %v993_v18 = vld [vmem:[#allocation5 + $0x848] sm:$0xff]  ;;  %v995_v19 = vld [vmem:[#allocation5 + $0x858] sm:$0xff]  ;;  %v2350_v22 = vpack.c.bf16 %v990_v14, %v988_v12  ;;  %v100_v23 = vld [vmem:[#allocation5 + $0x40] sm:$0xff]  ;;  %v2128_v25 = vpack.c.bf16 %v103_v17, %v101_v15 }
  0x78   :  { %2113 = vmatprep.subr.bf16.mxu1 %v2112_v27  ;;  %754 = vperm.xlu0 %2704, %v2965_v2   ;;  %v2352_v26 = vpack.c.bf16 %v995_v19, %v993_v18  ;;  %v992_v27 = vld [vmem:[#allocation5 + $0x840] sm:$0xff]  ;;  %v105_v29 = vld [vmem:[#allocation5 + $0x68] sm:$0xff]  ;;  %v107_v30 = vld [vmem:[#allocation5 + $0x78] sm:$0xff] }
  0x79   :  { %2335 = vmatpush1.bf16.msra.mxu0 %v2334_v24  ;;  %v102_v24 = vld [vmem:[#allocation5 + $0x50] sm:$0xff]  ;;  %v999_v31 = vld [vmem:[#allocation5 + $0x878] sm:$0xff]  ;;  %v104_v34 = vld [vmem:[#allocation5 + $0x60] sm:$0xff] }
  0x7a   :  { %2337 = vmatprep.subr.bf16.mxu0 %v2336_v28  ;;  %2700 = vset.pattern.permute.xlu1 %v2867_v48  ;;  %v994_v28 = vld [vmem:[#allocation5 + $0x850] sm:$0xff]  ;;  %v2130_v32 = vpack.c.bf16 %v102_v24, %v100_v23  ;;  %v996_v38 = vld [vmem:[#allocation5 + $0x860] sm:$0xff]  ;;  %v1001_v42 = vld [vmem:[#allocation5 + $0x888] sm:$0xff] }
  0x7b   :  { %2115 = vmatpush1.bf16.msra.mxu1 %v2114_v36  ;;  %530 = vperm.xlu1 %2700, %v2965_v2   ;;  %v2354_v33 = vpack.c.bf16 %v994_v28, %v992_v27  ;;  %v106_v35 = vld [vmem:[#allocation5 + $0x70] sm:$0xff]  ;;  %v2132_v36 = vpack.c.bf16 %v107_v30, %v105_v29  ;;  %v1003_v43 = vld [vmem:[#allocation5 + $0x898] sm:$0xff]  ;;  %v108_v46 = vld [vmem:[#allocation5 + $0x80] sm:$0xff] }
  0x7c   :  { %2117 = vmatprep.subr.bf16.mxu1 %v2116_v40  ;;  %2706 = vset.pattern.permute.xlu0 %v2872_v16  ;;  %v998_v39 = vld [vmem:[#allocation5 + $0x870] sm:$0xff]  ;;  %v109_v40 = vld [vmem:[#allocation5 + $0x88] sm:$0xff]  ;;  %v2134_v44 = vpack.c.bf16 %v106_v35, %v104_v34  ;;  %v1007_v55 = vld [vmem:[#allocation5 + $0x8b8] sm:$0xff] }
  0x7d   :  { %2339 = vmatpush1.bf16.msra.mxu0 %v2338_v37  ;;  %v2358_v45 = vpack.c.bf16 %v998_v39, %v996_v38  ;;  %v110_v47 = vld [vmem:[#allocation5 + $0x90] sm:$0xff]  ;;  %v1005_v54 = vld [vmem:[#allocation5 + $0x8a8] sm:$0xff]  ;;  %v112_v59 = vld [vmem:[#allocation5 + $0xa0] sm:$0xff] }
  0x7e   :  { %2341 = vmatprep.subr.bf16.mxu0 %v2340_v41  ;;  %v111_v41 = vld [vmem:[#allocation5 + $0x98] sm:$0xff]  ;;  %v114_v60 = vld [vmem:[#allocation5 + $0xb0] sm:$0xff]  ;;  %v2364_v62 = vpack.c.bf16 %v1007_v55, %v1005_v54  ;;  %v1004_v0 = vld [vmem:[#allocation5 + $0x8a0] sm:$0xff] }
  0x7f   :  { %2119 = vmatpush1.bf16.msra.mxu1 %v2118_v49  ;;  %2702 = vset.pattern.permute.xlu1 %v2868_v53  ;;  %v2136_v48 = vpack.c.bf16 %v111_v41, %v109_v40  ;;  %v2360_v49 = vpack.c.bf16 %v1003_v43, %v1001_v42  ;;  %v115_v53 = vld [vmem:[#allocation5 + $0xb8] sm:$0xff]  ;;  %v1006_v1 = vld [vmem:[#allocation5 + $0x8b0] sm:$0xff]  ;;  %v117_v3 = vld [vmem:[#allocation5 + $0xc8] sm:$0xff]  ;;  %v2142_v7 = vpack.c.bf16 %v114_v60, %v112_v59 }
  0x80   :  { %2121 = vmatprep.subr.bf16.mxu1 %v2120_v51  ;;  %642 = vperm.xlu1 %2702, %v2965_v2   ;;  %v1002_v51 = vld [vmem:[#allocation5 + $0x890] sm:$0xff]  ;;  %v1011_v6 = vld [vmem:[#allocation5 + $0x8d8] sm:$0xff]  ;;  %v1008_v14 = vld [vmem:[#allocation5 + $0x8c0] sm:$0xff] }
  0x81   :  { %2343 = vmatpush1.bf16.msra.mxu0 %v2342_v50  ;;  %v1000_v50 = vld [vmem:[#allocation5 + $0x880] sm:$0xff]  ;;  %v1010_v15 = vld [vmem:[#allocation5 + $0x8d0] sm:$0xff]  ;;  %v123_v17 = vld [vmem:[#allocation5 + $0xf8] sm:$0xff] }
  0x82   :  { %2345 = vmatprep.subr.bf16.mxu0 %v2344_v52  ;;  %v113_v52 = vld [vmem:[#allocation5 + $0xa8] sm:$0xff]  ;;  %v2362_v58 = vpack.c.bf16 %v1002_v51, %v1000_v50  ;;  %v1015_v19 = vld [vmem:[#allocation5 + $0x8f8] sm:$0xff]  ;;  %v2370_v23 = vpack.c.bf16 %v1010_v15, %v1008_v14  ;;  %v120_v24 = vld [vmem:[#allocation5 + $0xe0] sm:$0xff] }
  0x83   :  { %v2140_v61 = vpack.c.bf16 %v115_v53, %v113_v52  ;;  %v1013_v18 = vld [vmem:[#allocation5 + $0x8e8] sm:$0xff]  ;;  %v1012_v28 = vld [vmem:[#allocation5 + $0x8e0] sm:$0xff]  ;;  %v1014_v29 = vld [vmem:[#allocation5 + $0x8f0] sm:$0xff] }
  0x84   :  { %2703 = vset.pattern.permute.xlu1 %v2871_v56  ;;  %v2138_v56 = vpack.c.bf16 %v110_v47, %v108_v46  ;;  %v2372_v27 = vpack.c.bf16 %v1015_v19, %v1013_v18  ;;  %v313_v30 = vld [vmem:[#allocation5 + $0x208] sm:$0xff]  ;;  %v2374_v34 = vpack.c.bf16 %v1014_v29, %v1012_v28  ;;  %v312_v35 = vld [vmem:[#allocation5 + $0x200] sm:$0xff]  ;;  %v1098_v42 = vld [vmem:[#allocation5 + $0x910] sm:$0xff] }
  0x85   :  { %1650 = vperm.xlu1 %2703, %v2965_v2   ;;  %v1096_v41 = vld [vmem:[#allocation5 + $0x900] sm:$0xff]  ;;  %v317_v43 = vld [vmem:[#allocation5 + $0x228] sm:$0xff]  ;;  %v1103_v46 = vld [vmem:[#allocation5 + $0x938] sm:$0xff] }
  0x86   :  { %v318_v50 = vld [vmem:[#allocation5 + $0x230] sm:$0xff]  ;;  %v1100_v53 = vld [vmem:[#allocation5 + $0x920] sm:$0xff]  ;;  %v321_v55 = vld [vmem:[#allocation5 + $0x248] sm:$0xff] }
  0x87   :  { %v1102_v54 = vld [vmem:[#allocation5 + $0x930] sm:$0xff]  ;;  %v1107_v59 = vld [vmem:[#allocation5 + $0x958] sm:$0xff]  ;;  %v329_v19 = vld [vmem:[#allocation5 + $0x288] sm:$0xff] }
  0x88   :  { %v326_v14 = vld [vmem:[#allocation5 + $0x270] sm:$0xff] }
  0x89   :  { %2705 = vset.pattern.permute.xlu1 %v2872_v16  ;;  %v121_v16 = vld [vmem:[#allocation5 + $0xe8] sm:$0xff]  ;;  %v1110_v18 = vld [vmem:[#allocation5 + $0x970] sm:$0xff] }
  0x8a   :  { %1762 = vperm.xlu1 %2705, %v2965_v2   ;;  %v997_v2 = vld [vmem:[#allocation5 + $0x868] sm:$0xff]  ;;  %v330_v28 = vld [vmem:[#allocation5 + $0x290] sm:$0xff] }
  0x8b   :  { %v2356_v37 = vpack.c.bf16 %v999_v31, %v997_v2  ;;  %v315_v2 = vld [vmem:[#allocation5 + $0x218] sm:$0xff]  ;;  %v1097_v31 = vld [vmem:[#allocation5 + $0x908] sm:$0xff] }
  0x8c   :  { %v2152_v39 = vpack.c.bf16 %v315_v2, %v313_v30  ;;  %v1112_v2 = vld [vmem:[#allocation5 + $0x980] sm:$0xff] }
  0xdc   :  { %v126_v8 = vpop.permute.xlu1 %125  ;;  %v867_v9 = vpop.permute.xlu0 %866 }
  0xdd   :  { %vm127_vm0 = vcmp.eq.s32.totalorder %v2985_v63, %v126_v8  ;;  %vm868_vm1 = vcmp.eq.s32.totalorder %v2985_v63, %v867_v9  ;;  %v2366_v8 = vpack.c.bf16 %v1006_v1, %v1004_v0  ;;  %v116_v9 = vld [vmem:[#allocation5 + $0xc0] sm:$0xff]  ;;  %v322_v0 = vld [vmem:[#allocation5 + $0x250] sm:$0xff] }
  0xde   :  { %2022 = vmatmul.mubr.msk.f32.vlgmr.msra.gmra.mrb[0].mxu1 %vm127_vm0, %v2873_v20  ;;  %2035 = vmatmul.mubr.msk.f32.vlgmr.msra.gmra.mrb[0].mxu0 %vm868_vm1, %v2873_v20 }
  0xdf   :  { %2123 = vmatpush1.bf16.msra.mxu1 %v2122_v4  ;;  %2347 = vmatpush1.bf16.msra.mxu0 %v2346_v5  ;;  %v119_v4 = vld [vmem:[#allocation5 + $0xd8] sm:$0xff]  ;;  %v1009_v5 = vld [vmem:[#allocation5 + $0x8c8] sm:$0xff] }
  0xe0   :  { %2125 = vmatprep.subr.bf16.mxu1 %v2124_v10  ;;  %2349 = vmatprep.subr.bf16.mxu0 %v2348_v11  ;;  %v118_v10 = vld [vmem:[#allocation5 + $0xd0] sm:$0xff]  ;;  %v2144_v11 = vpack.c.bf16 %v119_v4, %v117_v3  ;;  %v2368_v12 = vpack.c.bf16 %v1011_v6, %v1009_v5  ;;  %v1104_v4 = vld [vmem:[#allocation5 + $0x940] sm:$0xff]  ;;  %v325_v6 = vld [vmem:[#allocation5 + $0x268] sm:$0xff] }
  0xe1   :  { %298 = vmatprep.mubr.f32.mxu1 %v2858_v13  ;;  %1080 = vmatprep.mubr.f32.mxu0 %v2858_v13  ;;  %v979_v38 = vpop.permute.xlu0 %978  ;;  %v1106_v5 = vld [vmem:[#allocation5 + $0x950] sm:$0xff] }
  0xe2   :  { %vm980_vm3 = vcmp.eq.s32.totalorder %v2985_v63, %v979_v38  ;;  %v332_v38 = vld [vmem:[#allocation5 + $0x2a0] sm:$0xff] }
  0xe3   :  { %2127 = vmatpush1.bf16.msra.mxu1 %v2126_v21  ;;  %2351 = vmatpush1.bf16.msra.mxu0 %v2350_v22  ;;  %v2994_v21 = vpop.permute.xlu1 %1090  ;;  %v2146_v22 = vpack.c.bf16 %v118_v10, %v116_v9  ;;  %v1111_v9 = vld [vmem:[#allocation5 + $0x978] sm:$0xff] }
  0xe4   :  { %2129 = vmatprep.subr.bf16.mxu1 %v2128_v25  ;;  %2353 = vmatprep.subr.bf16.mxu0 %v2352_v26  ;;  %v122_v25 = vld [vmem:[#allocation5 + $0xf0] sm:$0xff]  ;;  %v2148_v26 = vpack.c.bf16 %v123_v17, %v121_v16  ;;  %v1108_v17 = vld [vmem:[#allocation5 + $0x960] sm:$0xff]  ;;  %vm1092_vm4 = vcmp.eq.s32.totalorder %v2985_v63, %v2994_v21 }
  0xe7   :  { %2131 = vmatpush1.bf16.msra.mxu1 %v2130_v32  ;;  %2355 = vmatpush1.bf16.msra.mxu0 %v2354_v33  ;;  %v1099_v32 = vld [vmem:[#allocation5 + $0x918] sm:$0xff]  ;;  %v2150_v33 = vpack.c.bf16 %v122_v25, %v120_v24 }
  0xe8   :  { %2133 = vmatprep.subr.bf16.mxu1 %v2132_v36  ;;  %2357 = vmatprep.subr.bf16.mxu0 %v2356_v37  ;;  %v314_v36 = vld [vmem:[#allocation5 + $0x210] sm:$0xff]  ;;  %v88_v37 = vpop.permute.xlu1 %87  ;;  %v2376_v40 = vpack.c.bf16 %v1099_v32, %v1097_v31  ;;  %v1115_v24 = vld [vmem:[#allocation5 + $0x998] sm:$0xff]  ;;  %v333_v32 = vld [vmem:[#allocation5 + $0x2a8] sm:$0xff] }
  0xe9   :  { %v2154_v47 = vpack.c.bf16 %v314_v36, %v312_v35  ;;  %vm89_vm2 = vcmp.eq.s32.totalorder %v2985_v63, %v88_v37  ;;  %v1114_v31 = vld [vmem:[#allocation5 + $0x990] sm:$0xff]  ;;  %v1119_v35 = vld [vmem:[#allocation5 + $0x9b8] sm:$0xff] }
  0xea   :  { %v2394_v37 = vpack.c.bf16 %v1114_v31, %v1112_v2 }
  0xeb   :  { %2135 = vmatpush1.bf16.msra.mxu1 %v2134_v44  ;;  %2359 = vmatpush1.bf16.msra.mxu0 %v2358_v45  ;;  %v319_v44 = vld [vmem:[#allocation5 + $0x238] sm:$0xff]  ;;  %v1101_v45 = vld [vmem:[#allocation5 + $0x928] sm:$0xff] }
  0xec   :  { %2137 = vmatprep.subr.bf16.mxu1 %v2136_v48  ;;  %2361 = vmatprep.subr.bf16.mxu0 %v2360_v49  ;;  %v2378_v48 = vpack.c.bf16 %v1098_v42, %v1096_v41  ;;  %v316_v49 = vld [vmem:[#allocation5 + $0x220] sm:$0xff]  ;;  %v2156_v51 = vpack.c.bf16 %v319_v44, %v317_v43  ;;  %v2380_v52 = vpack.c.bf16 %v1103_v46, %v1101_v45  ;;  %v1118_v43 = vld [vmem:[#allocation5 + $0x9b0] sm:$0xff]  ;;  %v337_v44 = vld [vmem:[#allocation5 + $0x2c8] sm:$0xff] }
  0xed   :  { %v2158_v60 = vpack.c.bf16 %v318_v50, %v316_v49  ;;  %v1116_v42 = vld [vmem:[#allocation5 + $0x9a0] sm:$0xff]  ;;  %v339_v45 = vld [vmem:[#allocation5 + $0x2d8] sm:$0xff]  ;;  %v1121_v46 = vld [vmem:[#allocation5 + $0x9c8] sm:$0xff] }
  0xee   :  { %v2398_v49 = vpack.c.bf16 %v1118_v43, %v1116_v42  ;;  %v336_v50 = vld [vmem:[#allocation5 + $0x2c0] sm:$0xff] }
  0xef   :  { %2139 = vmatpush1.bf16.msra.mxu1 %v2138_v56  ;;  %2363 = vmatpush1.bf16.msra.mxu0 %v2362_v58  ;;  %v323_v56 = vld [vmem:[#allocation5 + $0x258] sm:$0xff]  ;;  %v1105_v58 = vld [vmem:[#allocation5 + $0x948] sm:$0xff] }
  0xf0   :  { %2141 = vmatprep.subr.bf16.mxu1 %v2140_v61  ;;  %2365 = vmatprep.subr.bf16.mxu0 %v2364_v62  ;;  %v2382_v61 = vpack.c.bf16 %v1102_v54, %v1100_v53  ;;  %v320_v62 = vld [vmem:[#allocation5 + $0x240] sm:$0xff]  ;;  %v2160_v1 = vpack.c.bf16 %v323_v56, %v321_v55  ;;  %v2384_v3 = vpack.c.bf16 %v1107_v59, %v1105_v58  ;;  %v1122_v55 = vld [vmem:[#allocation5 + $0x9d0] sm:$0xff]  ;;  %v341_v56 = vld [vmem:[#allocation5 + $0x2e8] sm:$0xff] }
  0xf1   :  { %v2162_v10 = vpack.c.bf16 %v322_v0, %v320_v62  ;;  %v1120_v54 = vld [vmem:[#allocation5 + $0x9c0] sm:$0xff]  ;;  %v343_v58 = vld [vmem:[#allocation5 + $0x2f8] sm:$0xff]  ;;  %v1125_v59 = vld [vmem:[#allocation5 + $0x9e8] sm:$0xff] }
  0xf2   :  { %v2402_v62 = vpack.c.bf16 %v1122_v55, %v1120_v54  ;;  %v340_v0 = vld [vmem:[#allocation5 + $0x2e0] sm:$0xff] }
  0xf3   :  { %2143 = vmatpush1.bf16.msra.mxu1 %v2142_v7  ;;  %2367 = vmatpush1.bf16.msra.mxu0 %v2366_v8  ;;  %v327_v7 = vld [vmem:[#allocation5 + $0x278] sm:$0xff]  ;;  %v1109_v8 = vld [vmem:[#allocation5 + $0x968] sm:$0xff]  ;;  %v1220_v55 = vld [vmem:[#allocation5 + $0xa60] sm:$0xff] }
  0xf4   :  { %2145 = vmatprep.subr.bf16.mxu1 %v2144_v11  ;;  %2369 = vmatprep.subr.bf16.mxu0 %v2368_v12  ;;  %v2386_v11 = vpack.c.bf16 %v1106_v5, %v1104_v4  ;;  %v324_v12 = vld [vmem:[#allocation5 + $0x260] sm:$0xff]  ;;  %v2164_v15 = vpack.c.bf16 %v327_v7, %v325_v6  ;;  %v2388_v16 = vpack.c.bf16 %v1111_v9, %v1109_v8  ;;  %v1126_v6 = vld [vmem:[#allocation5 + $0x9f0] sm:$0xff]  ;;  %v425_v7 = vld [vmem:[#allocation5 + $0x308] sm:$0xff] }
  0xf5   :  { %v2166_v25 = vpack.c.bf16 %v326_v14, %v324_v12  ;;  %v1124_v5 = vld [vmem:[#allocation5 + $0x9e0] sm:$0xff]  ;;  %v427_v8 = vld [vmem:[#allocation5 + $0x318] sm:$0xff]  ;;  %v1209_v9 = vld [vmem:[#allocation5 + $0xa08] sm:$0xff] }
  0xf6   :  { %v2406_v12 = vpack.c.bf16 %v1126_v6, %v1124_v5  ;;  %v424_v14 = vld [vmem:[#allocation5 + $0x300] sm:$0xff] }
  0xf7   :  { %2147 = vmatpush1.bf16.msra.mxu1 %v2146_v22  ;;  %2371 = vmatpush1.bf16.msra.mxu0 %v2370_v23  ;;  %v331_v22 = vld [vmem:[#allocation5 + $0x298] sm:$0xff]  ;;  %v1113_v23 = vld [vmem:[#allocation5 + $0x988] sm:$0xff]  ;;  %v1224_v6 = vld [vmem:[#allocation5 + $0xa80] sm:$0xff] }
  0xf8   :  { %2149 = vmatprep.subr.bf16.mxu1 %v2148_v26  ;;  %2373 = vmatprep.subr.bf16.mxu0 %v2372_v27  ;;  %v2390_v26 = vpack.c.bf16 %v1110_v18, %v1108_v17  ;;  %v328_v27 = vld [vmem:[#allocation5 + $0x280] sm:$0xff]  ;;  %v2168_v29 = vpack.c.bf16 %v331_v22, %v329_v19  ;;  %v2392_v30 = vpack.c.bf16 %v1115_v24, %v1113_v23  ;;  %v1210_v22 = vld [vmem:[#allocation5 + $0xa10] sm:$0xff]  ;;  %v429_v23 = vld [vmem:[#allocation5 + $0x328] sm:$0xff] }
  0xf9   :  { %v2170_v36 = vpack.c.bf16 %v330_v28, %v328_v27  ;;  %v2184_v17 = vpack.c.bf16 %v427_v8, %v425_v7  ;;  %v1208_v19 = vld [vmem:[#allocation5 + $0xa00] sm:$0xff]  ;;  %v431_v24 = vld [vmem:[#allocation5 + $0x338] sm:$0xff]  ;;  %v1226_v7 = vld [vmem:[#allocation5 + $0xa90] sm:$0xff] }
  0xfa   :  { %v2410_v28 = vpack.c.bf16 %v1210_v22, %v1208_v19  ;;  %v2188_v2 = vpack.c.bf16 %v431_v24, %v429_v23  ;;  %v445_v8 = vld [vmem:[#allocation5 + $0x3a8] sm:$0xff]  ;;  %v1228_v19 = vld [vmem:[#allocation5 + $0xaa0] sm:$0xff]  ;;  %v1230_v22 = vld [vmem:[#allocation5 + $0xab0] sm:$0xff] }
  0xfb   :  { %2151 = vmatpush1.bf16.msra.mxu1 %v2150_v33  ;;  %2375 = vmatpush1.bf16.msra.mxu0 %v2374_v34  ;;  %v335_v33 = vld [vmem:[#allocation5 + $0x2b8] sm:$0xff]  ;;  %v1117_v34 = vld [vmem:[#allocation5 + $0x9a8] sm:$0xff] }
  0xfc   :  { %2153 = vmatprep.subr.bf16.mxu1 %v2152_v39  ;;  %2377 = vmatprep.subr.bf16.mxu0 %v2376_v40  ;;  %v334_v39 = vld [vmem:[#allocation5 + $0x2b0] sm:$0xff]  ;;  %v2172_v40 = vpack.c.bf16 %v335_v33, %v333_v32  ;;  %v2396_v41 = vpack.c.bf16 %v1119_v35, %v1117_v34  ;;  %v1212_v32 = vld [vmem:[#allocation5 + $0xa20] sm:$0xff]  ;;  %v433_v34 = vld [vmem:[#allocation5 + $0x348] sm:$0xff] }
  0xfd   :  { %v1214_v33 = vld [vmem:[#allocation5 + $0xa30] sm:$0xff]  ;;  %v435_v35 = vld [vmem:[#allocation5 + $0x358] sm:$0xff]  ;;  %v449_v23 = vld [vmem:[#allocation5 + $0x3c8] sm:$0xff] }
  0xfe   :  { %2023 = vmatmul.mubr.msk.f32.vlgmr.msra.gmra.mrb[0].mxu1 %vm89_vm2, %v2873_v20  ;;  %2037 = vmatmul.mubr.msk.f32.vlgmr.msra.gmra.mrb[0].mxu0 %vm980_vm3, %v2873_v20  ;;  %v2192_v42 = vpack.c.bf16 %v435_v35, %v433_v34  ;;  %v451_v24 = vld [vmem:[#allocation5 + $0x3d8] sm:$0xff]  ;;  %v453_v34 = vld [vmem:[#allocation5 + $0x3e8] sm:$0xff] }
  0xff   :  { %2155 = vmatpush1.bf16.msra.mxu1 %v2154_v47  ;;  %2379 = vmatpush1.bf16.msra.mxu0 %v2378_v48  ;;  %v1123_v47 = vld [vmem:[#allocation5 + $0x9d8] sm:$0xff]  ;;  %v2174_v48 = vpack.c.bf16 %v334_v39, %v332_v38  ;;  %v2414_v39 = vpack.c.bf16 %v1214_v33, %v1212_v32  ;;  %v1232_v32 = vld [vmem:[#allocation5 + $0xac0] sm:$0xff]  ;;  %v1234_v33 = vld [vmem:[#allocation5 + $0xad0] sm:$0xff] }
 0x100   :  { %2157 = vmatprep.subr.bf16.mxu1 %v2156_v51  ;;  %2381 = vmatprep.subr.bf16.mxu0 %v2380_v52  ;;  %v338_v51 = vld [vmem:[#allocation5 + $0x2d0] sm:$0xff]  ;;  %v2176_v52 = vpack.c.bf16 %v339_v45, %v337_v44  ;;  %v2400_v53 = vpack.c.bf16 %v1123_v47, %v1121_v46  ;;  %v1216_v44 = vld [vmem:[#allocation5 + $0xa40] sm:$0xff]  ;;  %v437_v46 = vld [vmem:[#allocation5 + $0x368] sm:$0xff] }
 0x101   :  { %408 = vmatprep.mubr.f32.mxu1 %v2858_v13  ;;  %1192 = vmatprep.mubr.f32.mxu0 %v2858_v13  ;;  %v1218_v45 = vld [vmem:[#allocation5 + $0xa50] sm:$0xff]  ;;  %v439_v47 = vld [vmem:[#allocation5 + $0x378] sm:$0xff] }
 0x102   :  { %v455_v35 = vld [vmem:[#allocation5 + $0x3f8] sm:$0xff] }
 0x103   :  { %2159 = vmatpush1.bf16.msra.mxu1 %v2158_v60  ;;  %2383 = vmatpush1.bf16.msra.mxu0 %v2382_v61  ;;  %v1127_v60 = vld [vmem:[#allocation5 + $0x9f8] sm:$0xff]  ;;  %v2178_v61 = vpack.c.bf16 %v338_v51, %v336_v50  ;;  %v2418_v50 = vpack.c.bf16 %v1218_v45, %v1216_v44  ;;  %v436_v51 = vld [vmem:[#allocation5 + $0x360] sm:$0xff] }
 0x104   :  { %2161 = vmatprep.subr.bf16.mxu1 %v2160_v1  ;;  %2385 = vmatprep.subr.bf16.mxu0 %v2384_v3  ;;  %v342_v1 = vld [vmem:[#allocation5 + $0x2f0] sm:$0xff]  ;;  %v2180_v3 = vpack.c.bf16 %v343_v58, %v341_v56  ;;  %v2404_v4 = vpack.c.bf16 %v1127_v60, %v1125_v59  ;;  %v441_v58 = vld [vmem:[#allocation5 + $0x388] sm:$0xff]  ;;  %v443_v59 = vld [vmem:[#allocation5 + $0x398] sm:$0xff] }
 0x105   :  { %v1222_v56 = vld [vmem:[#allocation5 + $0xa70] sm:$0xff]  ;;  %v1225_v60 = vld [vmem:[#allocation5 + $0xa88] sm:$0xff]  ;;  %v1236_v45 = vld [vmem:[#allocation5 + $0xae0] sm:$0xff] }
 0x107   :  { %2163 = vmatpush1.bf16.msra.mxu1 %v2162_v10  ;;  %2387 = vmatpush1.bf16.msra.mxu0 %v2386_v11  ;;  %v1211_v10 = vld [vmem:[#allocation5 + $0xa18] sm:$0xff]  ;;  %v2182_v11 = vpack.c.bf16 %v342_v1, %v340_v0  ;;  %v2422_v0 = vpack.c.bf16 %v1222_v56, %v1220_v55  ;;  %v440_v1 = vld [vmem:[#allocation5 + $0x380] sm:$0xff] }
 0x108   :  { %2165 = vmatprep.subr.bf16.mxu1 %v2164_v15  ;;  %2389 = vmatprep.subr.bf16.mxu0 %v2388_v16  ;;  %v426_v15 = vld [vmem:[#allocation5 + $0x310] sm:$0xff]  ;;  %v307_v16 = vpop.permute.xlu1 %306  ;;  %v2408_v18 = vpack.c.bf16 %v1211_v10, %v1209_v9  ;;  %v447_v9 = vld [vmem:[#allocation5 + $0x3b8] sm:$0xff]  ;;  %v1229_v10 = vld [vmem:[#allocation5 + $0xaa8] sm:$0xff] }
 0x109   :  { %v2186_v27 = vpack.c.bf16 %v426_v15, %v424_v14  ;;  %vm308_vm5 = vcmp.eq.s32.totalorder %v2985_v63, %v307_v16  ;;  %v2426_v14 = vpack.c.bf16 %v1226_v7, %v1224_v6  ;;  %v444_v15 = vld [vmem:[#allocation5 + $0x3a0] sm:$0xff]  ;;  %v446_v16 = vld [vmem:[#allocation5 + $0x3b0] sm:$0xff] }
 0x10b   :  { %2167 = vmatpush1.bf16.msra.mxu1 %v2166_v25  ;;  %2391 = vmatpush1.bf16.msra.mxu0 %v2390_v26  ;;  %v1213_v25 = vld [vmem:[#allocation5 + $0xa28] sm:$0xff]  ;;  %v1215_v26 = vld [vmem:[#allocation5 + $0xa38] sm:$0xff] }
 0x10c   :  { %2169 = vmatprep.subr.bf16.mxu1 %v2168_v29  ;;  %2393 = vmatprep.subr.bf16.mxu0 %v2392_v30  ;;  %v428_v29 = vld [vmem:[#allocation5 + $0x320] sm:$0xff]  ;;  %v430_v30 = vld [vmem:[#allocation5 + $0x330] sm:$0xff]  ;;  %v2412_v31 = vpack.c.bf16 %v1215_v26, %v1213_v25  ;;  %v1233_v25 = vld [vmem:[#allocation5 + $0xac8] sm:$0xff] }
 0x10d   :  { %v2190_v38 = vpack.c.bf16 %v430_v30, %v428_v29  ;;  %v1235_v26 = vld [vmem:[#allocation5 + $0xad8] sm:$0xff]  ;;  %v448_v29 = vld [vmem:[#allocation5 + $0x3c0] sm:$0xff]  ;;  %v450_v30 = vld [vmem:[#allocation5 + $0x3d0] sm:$0xff] }
 0x10f   :  { %2171 = vmatpush1.bf16.msra.mxu1 %v2170_v36  ;;  %2395 = vmatpush1.bf16.msra.mxu0 %v2394_v37  ;;  %v1217_v36 = vld [vmem:[#allocation5 + $0xa48] sm:$0xff]  ;;  %v1219_v37 = vld [vmem:[#allocation5 + $0xa58] sm:$0xff] }
 0x110   :  { %2173 = vmatprep.subr.bf16.mxu1 %v2172_v40  ;;  %2397 = vmatprep.subr.bf16.mxu0 %v2396_v41  ;;  %v432_v40 = vld [vmem:[#allocation5 + $0x340] sm:$0xff]  ;;  %v434_v41 = vld [vmem:[#allocation5 + $0x350] sm:$0xff]  ;;  %v2416_v43 = vpack.c.bf16 %v1219_v37, %v1217_v36  ;;  %v1237_v36 = vld [vmem:[#allocation5 + $0xae8] sm:$0xff] }
 0x111   :  { %v2194_v21 = vpack.c.bf16 %v434_v41, %v432_v40  ;;  %v1239_v37 = vld [vmem:[#allocation5 + $0xaf8] sm:$0xff]  ;;  %v2434_v40 = vpack.c.bf16 %v1234_v33, %v1232_v32  ;;  %v452_v41 = vld [vmem:[#allocation5 + $0x3e0] sm:$0xff] }
 0x112   :  { %v2436_v44 = vpack.c.bf16 %v1239_v37, %v1237_v36  ;;  %v553_v36 = vld [vmem:[#allocation5 + $0x488] sm:$0xff]  ;;  %v555_v37 = vld [vmem:[#allocation5 + $0x498] sm:$0xff] }
 0x113   :  { %2175 = vmatpush1.bf16.msra.mxu1 %v2174_v48  ;;  %2399 = vmatpush1.bf16.msra.mxu0 %v2398_v49  ;;  %v1221_v48 = vld [vmem:[#allocation5 + $0xa68] sm:$0xff]  ;;  %v1223_v49 = vld [vmem:[#allocation5 + $0xa78] sm:$0xff] }
 0x114   :  { %2177 = vmatprep.subr.bf16.mxu1 %v2176_v52  ;;  %2401 = vmatprep.subr.bf16.mxu0 %v2400_v53  ;;  %v438_v52 = vld [vmem:[#allocation5 + $0x370] sm:$0xff]  ;;  %v2196_v53 = vpack.c.bf16 %v439_v47, %v437_v46  ;;  %v2420_v54 = vpack.c.bf16 %v1223_v49, %v1221_v48  ;;  %v537_v47 = vld [vmem:[#allocation5 + $0x408] sm:$0xff]  ;;  %v539_v48 = vld [vmem:[#allocation5 + $0x418] sm:$0xff] }
 0x115   :  { %v1238_v46 = vld [vmem:[#allocation5 + $0xaf0] sm:$0xff]  ;;  %v1321_v49 = vld [vmem:[#allocation5 + $0xb08] sm:$0xff]  ;;  %v2216_v55 = vpack.c.bf16 %v539_v48, %v537_v47 }
 0x116   :  { %v1338_v47 = vld [vmem:[#allocation5 + $0xb90] sm:$0xff]  ;;  %v557_v48 = vld [vmem:[#allocation5 + $0x4a8] sm:$0xff] }
 0x117   :  { %2179 = vmatpush1.bf16.msra.mxu1 %v2178_v61  ;;  %2403 = vmatpush1.bf16.msra.mxu0 %v2402_v62  ;;  %v1227_v61 = vld [vmem:[#allocation5 + $0xa98] sm:$0xff]  ;;  %v2198_v62 = vpack.c.bf16 %v438_v52, %v436_v51  ;;  %v2438_v51 = vpack.c.bf16 %v1238_v46, %v1236_v45  ;;  %v536_v52 = vld [vmem:[#allocation5 + $0x400] sm:$0xff] }
 0x118   :  { %2181 = vmatprep.subr.bf16.mxu1 %v2180_v3  ;;  %2405 = vmatprep.subr.bf16.mxu0 %v2404_v4  ;;  %v442_v3 = vld [vmem:[#allocation5 + $0x390] sm:$0xff]  ;;  %v2200_v4 = vpack.c.bf16 %v443_v59, %v441_v58  ;;  %v2424_v5 = vpack.c.bf16 %v1227_v61, %v1225_v60  ;;  %v1320_v58 = vld [vmem:[#allocation5 + $0xb00] sm:$0xff]  ;;  %v541_v60 = vld [vmem:[#allocation5 + $0x428] sm:$0xff] }
 0x119   :  { %v1322_v59 = vld [vmem:[#allocation5 + $0xb10] sm:$0xff]  ;;  %v543_v61 = vld [vmem:[#allocation5 + $0x438] sm:$0xff]  ;;  %v1336_v46 = vld [vmem:[#allocation5 + $0xb80] sm:$0xff] }
 0x11a   :  { %v2220_v6 = vpack.c.bf16 %v543_v61, %v541_v60  ;;  %v3020_v60 = vpop.permute.xlu1 %1314  ;;  %v561_v61 = vld [vmem:[#allocation5 + $0x4c8] sm:$0xff] }
 0x11b   :  { %2183 = vmatpush1.bf16.msra.mxu1 %v2182_v11  ;;  %2407 = vmatpush1.bf16.msra.mxu0 %v2406_v12  ;;  %v1231_v11 = vld [vmem:[#allocation5 + $0xab8] sm:$0xff]  ;;  %v2202_v12 = vpack.c.bf16 %v442_v3, %v440_v1  ;;  %v2442_v3 = vpack.c.bf16 %v1322_v59, %v1320_v58  ;;  %v1340_v58 = vld [vmem:[#allocation5 + $0xba0] sm:$0xff]  ;;  %v1342_v59 = vld [vmem:[#allocation5 + $0xbb0] sm:$0xff]  ;;  %vm1316_vm8 = vcmp.eq.s32.totalorder %v2985_v63, %v3020_v60 }
 0x11c   :  { %2185 = vmatprep.subr.bf16.mxu1 %v2184_v17  ;;  %2409 = vmatprep.subr.bf16.mxu0 %v2408_v18  ;;  %v2204_v17 = vpack.c.bf16 %v447_v9, %v445_v8  ;;  %v2428_v18 = vpack.c.bf16 %v1231_v11, %v1229_v10  ;;  %v1324_v8 = vld [vmem:[#allocation5 + $0xb20] sm:$0xff]  ;;  %v1326_v9 = vld [vmem:[#allocation5 + $0xb30] sm:$0xff]  ;;  %v545_v10 = vld [vmem:[#allocation5 + $0x448] sm:$0xff] }
 0x11d   :  { %v547_v11 = vld [vmem:[#allocation5 + $0x458] sm:$0xff] }
 0x11e   :  { %2025 = vmatmul.mubr.msk.f32.vlgmr.msra.gmra.mrb[0].mxu1 %vm308_vm5, %v2873_v20  ;;  %2039 = vmatmul.mubr.msk.f32.vlgmr.msra.gmra.mrb[0].mxu0 %vm1092_vm4, %v2873_v20 }
 0x11f   :  { %2187 = vmatpush1.bf16.msra.mxu1 %v2186_v27  ;;  %2411 = vmatpush1.bf16.msra.mxu0 %v2410_v28  ;;  %v2206_v27 = vpack.c.bf16 %v446_v16, %v444_v15  ;;  %v2430_v28 = vpack.c.bf16 %v1230_v22, %v1228_v19  ;;  %v2446_v16 = vpack.c.bf16 %v1326_v9, %v1324_v8  ;;  %v1344_v9 = vld [vmem:[#allocation5 + $0xbc0] sm:$0xff] }
 0x120   :  { %2189 = vmatprep.subr.bf16.mxu1 %v2188_v2  ;;  %2413 = vmatprep.subr.bf16.mxu0 %v2412_v31  ;;  %v2208_v2 = vpack.c.bf16 %v451_v24, %v449_v23  ;;  %v2432_v31 = vpack.c.bf16 %v1235_v26, %v1233_v25  ;;  %v2224_v19 = vpack.c.bf16 %v547_v11, %v545_v10  ;;  %v1328_v23 = vld [vmem:[#allocation5 + $0xb40] sm:$0xff]  ;;  %v1330_v24 = vld [vmem:[#allocation5 + $0xb50] sm:$0xff]  ;;  %v549_v25 = vld [vmem:[#allocation5 + $0x468] sm:$0xff] }
 0x121   :  { %520 = vmatprep.mubr.f32.mxu1 %v2858_v13  ;;  %1304 = vmatprep.mubr.f32.mxu0 %v2858_v13  ;;  %v551_v26 = vld [vmem:[#allocation5 + $0x478] sm:$0xff]  ;;  %v1346_v10 = vld [vmem:[#allocation5 + $0xbd0] sm:$0xff]  ;;  %v565_v11 = vld [vmem:[#allocation5 + $0x4e8] sm:$0xff] }
 0x122   :  { %v2228_v32 = vpack.c.bf16 %v551_v26, %v549_v25  ;;  %v1348_v25 = vld [vmem:[#allocation5 + $0xbe0] sm:$0xff]  ;;  %v1350_v26 = vld [vmem:[#allocation5 + $0xbf0] sm:$0xff] }
 0x123   :  { %2191 = vmatpush1.bf16.msra.mxu1 %v2190_v38  ;;  %2415 = vmatpush1.bf16.msra.mxu0 %v2414_v39  ;;  %v1203_v38 = vpop.permute.xlu0 %1202  ;;  %v2210_v39 = vpack.c.bf16 %v450_v30, %v448_v29  ;;  %v2450_v30 = vpack.c.bf16 %v1330_v24, %v1328_v23 }
 0x124   :  { %2193 = vmatprep.subr.bf16.mxu1 %v2192_v42  ;;  %2417 = vmatprep.subr.bf16.mxu0 %v2416_v43  ;;  %v454_v42 = vld [vmem:[#allocation5 + $0x3f0] sm:$0xff]  ;;  %v2212_v43 = vpack.c.bf16 %v455_v35, %v453_v34  ;;  %vm1204_vm6 = vcmp.eq.s32.totalorder %v2985_v63, %v1203_v38  ;;  %v1332_v34 = vld [vmem:[#allocation5 + $0xb60] sm:$0xff]  ;;  %v1337_v38 = vld [vmem:[#allocation5 + $0xb88] sm:$0xff] }
 0x125   :  { %v1334_v35 = vld [vmem:[#allocation5 + $0xb70] sm:$0xff] }
 0x127   :  { %2195 = vmatpush1.bf16.msra.mxu1 %v2194_v21  ;;  %2419 = vmatpush1.bf16.msra.mxu0 %v2418_v50  ;;  %v1323_v21 = vld [vmem:[#allocation5 + $0xb18] sm:$0xff]  ;;  %v2214_v50 = vpack.c.bf16 %v454_v42, %v452_v41  ;;  %v2454_v41 = vpack.c.bf16 %v1334_v35, %v1332_v34  ;;  %v552_v42 = vld [vmem:[#allocation5 + $0x480] sm:$0xff] }
 0x128   :  { %2197 = vmatprep.subr.bf16.mxu1 %v2196_v53  ;;  %2421 = vmatprep.subr.bf16.mxu0 %v2420_v54  ;;  %v538_v53 = vld [vmem:[#allocation5 + $0x410] sm:$0xff]  ;;  %v419_v54 = vpop.permute.xlu0 %418  ;;  %v2440_v56 = vpack.c.bf16 %v1323_v21, %v1321_v49  ;;  %v559_v49 = vld [vmem:[#allocation5 + $0x4b8] sm:$0xff]  ;;  %v1341_v21 = vld [vmem:[#allocation5 + $0xba8] sm:$0xff] }
 0x129   :  { %v2218_v1 = vpack.c.bf16 %v538_v53, %v536_v52  ;;  %vm420_vm7 = vcmp.eq.s32.totalorder %v2985_v63, %v419_v54  ;;  %v2458_v52 = vpack.c.bf16 %v1338_v47, %v1336_v46  ;;  %v556_v53 = vld [vmem:[#allocation5 + $0x4a0] sm:$0xff]  ;;  %v558_v54 = vld [vmem:[#allocation5 + $0x4b0] sm:$0xff] }
 0x12a   :  { %v654_v46 = vld [vmem:[#allocation5 + $0x530] sm:$0xff] }
 0x12b   :  { %2199 = vmatpush1.bf16.msra.mxu1 %v2198_v62  ;;  %2423 = vmatpush1.bf16.msra.mxu0 %v2422_v0  ;;  %v1325_v62 = vld [vmem:[#allocation5 + $0xb28] sm:$0xff]  ;;  %v1327_v0 = vld [vmem:[#allocation5 + $0xb38] sm:$0xff] }
 0x12c   :  { %2201 = vmatprep.subr.bf16.mxu1 %v2200_v4  ;;  %2425 = vmatprep.subr.bf16.mxu0 %v2424_v5  ;;  %v540_v4 = vld [vmem:[#allocation5 + $0x420] sm:$0xff]  ;;  %v542_v5 = vld [vmem:[#allocation5 + $0x430] sm:$0xff]  ;;  %v2444_v7 = vpack.c.bf16 %v1327_v0, %v1325_v62  ;;  %v563_v62 = vld [vmem:[#allocation5 + $0x4d8] sm:$0xff] }
 0x12d   :  { %v2222_v15 = vpack.c.bf16 %v542_v5, %v540_v4  ;;  %v1345_v0 = vld [vmem:[#allocation5 + $0xbc8] sm:$0xff]  ;;  %v2462_v4 = vpack.c.bf16 %v1342_v59, %v1340_v58  ;;  %v560_v5 = vld [vmem:[#allocation5 + $0x4c0] sm:$0xff]  ;;  %v658_v58 = vld [vmem:[#allocation5 + $0x550] sm:$0xff] }
 0x12f   :  { %2203 = vmatpush1.bf16.msra.mxu1 %v2202_v12  ;;  %2427 = vmatpush1.bf16.msra.mxu0 %v2426_v14  ;;  %v1329_v12 = vld [vmem:[#allocation5 + $0xb48] sm:$0xff]  ;;  %v1331_v14 = vld [vmem:[#allocation5 + $0xb58] sm:$0xff] }
 0x130   :  { %2205 = vmatprep.subr.bf16.mxu1 %v2204_v17  ;;  %2429 = vmatprep.subr.bf16.mxu0 %v2428_v18  ;;  %v544_v17 = vld [vmem:[#allocation5 + $0x440] sm:$0xff]  ;;  %v546_v18 = vld [vmem:[#allocation5 + $0x450] sm:$0xff]  ;;  %v2448_v22 = vpack.c.bf16 %v1331_v14, %v1329_v12  ;;  %v567_v12 = vld [vmem:[#allocation5 + $0x4f8] sm:$0xff] }
 0x131   :  { %v2226_v29 = vpack.c.bf16 %v546_v18, %v544_v17  ;;  %v1349_v14 = vld [vmem:[#allocation5 + $0xbe8] sm:$0xff]  ;;  %v2466_v18 = vpack.c.bf16 %v1346_v10, %v1344_v9  ;;  %v2244_v23 = vpack.c.bf16 %v567_v12, %v565_v11  ;;  %v1444_v11 = vld [vmem:[#allocation5 + $0xc60] sm:$0xff]  ;;  %v1446_v12 = vld [vmem:[#allocation5 + $0xc70] sm:$0xff] }
 0x133   :  { %2207 = vmatpush1.bf16.msra.mxu1 %v2206_v27  ;;  %2431 = vmatpush1.bf16.msra.mxu0 %v2430_v28  ;;  %v1333_v27 = vld [vmem:[#allocation5 + $0xb68] sm:$0xff]  ;;  %v1335_v28 = vld [vmem:[#allocation5 + $0xb78] sm:$0xff] }
 0x134   :  { %2209 = vmatprep.subr.bf16.mxu1 %v2208_v2  ;;  %2433 = vmatprep.subr.bf16.mxu0 %v2432_v31  ;;  %v548_v2 = vld [vmem:[#allocation5 + $0x460] sm:$0xff]  ;;  %v550_v31 = vld [vmem:[#allocation5 + $0x470] sm:$0xff]  ;;  %v2452_v33 = vpack.c.bf16 %v1335_v28, %v1333_v27  ;;  %v649_v27 = vld [vmem:[#allocation5 + $0x508] sm:$0xff] }
 0x135   :  { %v651_v28 = vld [vmem:[#allocation5 + $0x518] sm:$0xff] }
 0x136   :  { %v2248_v35 = vpack.c.bf16 %v651_v28, %v649_v27  ;;  %v1448_v27 = vld [vmem:[#allocation5 + $0xc80] sm:$0xff]  ;;  %v1450_v28 = vld [vmem:[#allocation5 + $0xc90] sm:$0xff] }
 0x137   :  { %2211 = vmatpush1.bf16.msra.mxu1 %v2210_v39  ;;  %2435 = vmatpush1.bf16.msra.mxu0 %v2434_v40  ;;  %v1339_v39 = vld [vmem:[#allocation5 + $0xb98] sm:$0xff]  ;;  %v2230_v40 = vpack.c.bf16 %v550_v31, %v548_v2  ;;  %v2470_v31 = vpack.c.bf16 %v1350_v26, %v1348_v25 }
 0x138   :  { %2213 = vmatprep.subr.bf16.mxu1 %v2212_v43  ;;  %2437 = vmatprep.subr.bf16.mxu0 %v2436_v44  ;;  %v554_v43 = vld [vmem:[#allocation5 + $0x490] sm:$0xff]  ;;  %v2232_v44 = vpack.c.bf16 %v555_v37, %v553_v36  ;;  %v2456_v45 = vpack.c.bf16 %v1339_v39, %v1337_v38  ;;  %v1432_v37 = vld [vmem:[#allocation5 + $0xc00] sm:$0xff]  ;;  %v653_v39 = vld [vmem:[#allocation5 + $0x528] sm:$0xff] }
 0x139   :  { %v1434_v38 = vld [vmem:[#allocation5 + $0xc10] sm:$0xff] }
 0x13b   :  { %2215 = vmatpush1.bf16.msra.mxu1 %v2214_v50  ;;  %2439 = vmatpush1.bf16.msra.mxu0 %v2438_v51  ;;  %v1343_v50 = vld [vmem:[#allocation5 + $0xbb8] sm:$0xff]  ;;  %v2234_v51 = vpack.c.bf16 %v554_v43, %v552_v42 }
 0x13c   :  { %2217 = vmatprep.subr.bf16.mxu1 %v2216_v55  ;;  %2441 = vmatprep.subr.bf16.mxu0 %v2440_v56  ;;  %v2236_v55 = vpack.c.bf16 %v559_v49, %v557_v48  ;;  %v2460_v56 = vpack.c.bf16 %v1343_v50, %v1341_v21  ;;  %v1439_v42 = vld [vmem:[#allocation5 + $0xc38] sm:$0xff]  ;;  %v1436_v49 = vld [vmem:[#allocation5 + $0xc20] sm:$0xff]  ;;  %v1438_v21 = vld [vmem:[#allocation5 + $0xc30] sm:$0xff] }
 0x13d   :  { %v657_v50 = vld [vmem:[#allocation5 + $0x548] sm:$0xff] }
 0x13e   :  { %2027 = vmatmul.mubr.msk.f32.vlgmr.msra.gmra.mrb[0].mxu1 %vm420_vm7, %v2873_v20  ;;  %2041 = vmatmul.mubr.msk.f32.vlgmr.msra.gmra.mrb[0].mxu0 %vm1204_vm6, %v2873_v20 }
 0x13f   :  { %2219 = vmatpush1.bf16.msra.mxu1 %v2218_v1  ;;  %2443 = vmatpush1.bf16.msra.mxu0 %v2442_v3  ;;  %v1347_v1 = vld [vmem:[#allocation5 + $0xbd8] sm:$0xff]  ;;  %v2238_v3 = vpack.c.bf16 %v558_v54, %v556_v53 }
 0x140   :  { %2221 = vmatprep.subr.bf16.mxu1 %v2220_v6  ;;  %2445 = vmatprep.subr.bf16.mxu0 %v2444_v7  ;;  %v562_v6 = vld [vmem:[#allocation5 + $0x4d0] sm:$0xff]  ;;  %v2240_v7 = vpack.c.bf16 %v563_v62, %v561_v61  ;;  %v2464_v8 = vpack.c.bf16 %v1347_v1, %v1345_v0  ;;  %v1443_v53 = vld [vmem:[#allocation5 + $0xc58] sm:$0xff]  ;;  %v1440_v62 = vld [vmem:[#allocation5 + $0xc40] sm:$0xff] }
 0x141   :  { %632 = vmatprep.mubr.f32.mxu1 %v2858_v13  ;;  %1416 = vmatprep.mubr.f32.mxu0 %v2858_v13  ;;  %v2242_v17 = vpack.c.bf16 %v562_v6, %v560_v5  ;;  %v1442_v0 = vld [vmem:[#allocation5 + $0xc50] sm:$0xff]  ;;  %v661_v1 = vld [vmem:[#allocation5 + $0x568] sm:$0xff]  ;;  %v1447_v5 = vld [vmem:[#allocation5 + $0xc78] sm:$0xff] }
 0x142   :  { %v2482_v6 = vpack.c.bf16 %v1442_v0, %v1440_v62  ;;  %v1460_v0 = vld [vmem:[#allocation5 + $0xce0] sm:$0xff] }
 0x143   :  { %2223 = vmatpush1.bf16.msra.mxu1 %v2222_v15  ;;  %2447 = vmatpush1.bf16.msra.mxu0 %v2446_v16  ;;  %v1351_v15 = vld [vmem:[#allocation5 + $0xbf8] sm:$0xff]  ;;  %v3022_v16 = vpop.permute.xlu1 %1426 }
 0x144   :  { %2225 = vmatprep.subr.bf16.mxu1 %v2224_v19  ;;  %2449 = vmatprep.subr.bf16.mxu0 %v2448_v22  ;;  %v564_v19 = vld [vmem:[#allocation5 + $0x4e0] sm:$0xff]  ;;  %v566_v22 = vld [vmem:[#allocation5 + $0x4f0] sm:$0xff]  ;;  %v2468_v24 = vpack.c.bf16 %v1351_v15, %v1349_v14  ;;  %v665_v14 = vld [vmem:[#allocation5 + $0x588] sm:$0xff]  ;;  %vm1428_vm10 = vcmp.eq.s32.totalorder %v2985_v63, %v3022_v16 }
 0x145   :  { %v2246_v2 = vpack.c.bf16 %v566_v22, %v564_v19  ;;  %v667_v15 = vld [vmem:[#allocation5 + $0x598] sm:$0xff]  ;;  %v2486_v22 = vpack.c.bf16 %v1446_v12, %v1444_v11 }
 0x146   :  { %v2264_v25 = vpack.c.bf16 %v667_v15, %v665_v14  ;;  %v1544_v14 = vld [vmem:[#allocation5 + $0xd00] sm:$0xff]  ;;  %v1546_v15 = vld [vmem:[#allocation5 + $0xd10] sm:$0xff] }
 0x147   :  { %2227 = vmatpush1.bf16.msra.mxu1 %v2226_v29  ;;  %2451 = vmatpush1.bf16.msra.mxu0 %v2450_v30  ;;  %v1433_v29 = vld [vmem:[#allocation5 + $0xc08] sm:$0xff]  ;;  %v1435_v30 = vld [vmem:[#allocation5 + $0xc18] sm:$0xff]  ;;  %v531_v34 = vpop.permute.xlu1 %530 }
 0x148   :  { %2229 = vmatprep.subr.bf16.mxu1 %v2228_v32  ;;  %2453 = vmatprep.subr.bf16.mxu0 %v2452_v33  ;;  %v648_v32 = vld [vmem:[#allocation5 + $0x500] sm:$0xff]  ;;  %v650_v33 = vld [vmem:[#allocation5 + $0x510] sm:$0xff]  ;;  %v2472_v36 = vpack.c.bf16 %v1435_v30, %v1433_v29  ;;  %vm532_vm9 = vcmp.eq.s32.totalorder %v2985_v63, %v531_v34  ;;  %v669_v29 = vld [vmem:[#allocation5 + $0x5a8] sm:$0xff] }
 0x149   :  { %v2250_v43 = vpack.c.bf16 %v650_v33, %v648_v32  ;;  %v671_v30 = vld [vmem:[#allocation5 + $0x5b8] sm:$0xff]  ;;  %v2490_v33 = vpack.c.bf16 %v1450_v28, %v1448_v27  ;;  %v668_v34 = vld [vmem:[#allocation5 + $0x5a0] sm:$0xff] }
 0x14b   :  { %2231 = vmatpush1.bf16.msra.mxu1 %v2230_v40  ;;  %2455 = vmatpush1.bf16.msra.mxu0 %v2454_v41  ;;  %v655_v40 = vld [vmem:[#allocation5 + $0x538] sm:$0xff]  ;;  %v1437_v41 = vld [vmem:[#allocation5 + $0xc28] sm:$0xff] }
 0x14c   :  { %2233 = vmatprep.subr.bf16.mxu1 %v2232_v44  ;;  %2457 = vmatprep.subr.bf16.mxu0 %v2456_v45  ;;  %v2474_v44 = vpack.c.bf16 %v1434_v38, %v1432_v37  ;;  %v652_v45 = vld [vmem:[#allocation5 + $0x520] sm:$0xff]  ;;  %v2252_v47 = vpack.c.bf16 %v655_v40, %v653_v39  ;;  %v2476_v48 = vpack.c.bf16 %v1439_v42, %v1437_v41  ;;  %v1454_v39 = vld [vmem:[#allocation5 + $0xcb0] sm:$0xff]  ;;  %v673_v40 = vld [vmem:[#allocation5 + $0x5c8] sm:$0xff] }
 0x14d   :  { %v2254_v54 = vpack.c.bf16 %v654_v46, %v652_v45  ;;  %v1452_v38 = vld [vmem:[#allocation5 + $0xca0] sm:$0xff]  ;;  %v675_v41 = vld [vmem:[#allocation5 + $0x5d8] sm:$0xff]  ;;  %v1457_v42 = vld [vmem:[#allocation5 + $0xcc8] sm:$0xff] }
 0x14e   :  { %v2494_v45 = vpack.c.bf16 %v1454_v39, %v1452_v38  ;;  %v672_v46 = vld [vmem:[#allocation5 + $0x5c0] sm:$0xff] }
 0x14f   :  { %2235 = vmatpush1.bf16.msra.mxu1 %v2234_v51  ;;  %2459 = vmatpush1.bf16.msra.mxu0 %v2458_v52  ;;  %v659_v51 = vld [vmem:[#allocation5 + $0x558] sm:$0xff]  ;;  %v1441_v52 = vld [vmem:[#allocation5 + $0xc48] sm:$0xff] }
 0x150   :  { %2237 = vmatprep.subr.bf16.mxu1 %v2236_v55  ;;  %2461 = vmatprep.subr.bf16.mxu0 %v2460_v56  ;;  %v2478_v55 = vpack.c.bf16 %v1438_v21, %v1436_v49  ;;  %v656_v56 = vld [vmem:[#allocation5 + $0x540] sm:$0xff]  ;;  %v2256_v59 = vpack.c.bf16 %v659_v51, %v657_v50  ;;  %v2480_v61 = vpack.c.bf16 %v1443_v53, %v1441_v52  ;;  %v1458_v50 = vld [vmem:[#allocation5 + $0xcd0] sm:$0xff]  ;;  %v677_v51 = vld [vmem:[#allocation5 + $0x5e8] sm:$0xff] }
 0x151   :  { %v2258_v60 = vpack.c.bf16 %v658_v58, %v656_v56  ;;  %v1456_v21 = vld [vmem:[#allocation5 + $0xcc0] sm:$0xff]  ;;  %v679_v52 = vld [vmem:[#allocation5 + $0x5f8] sm:$0xff]  ;;  %v1461_v53 = vld [vmem:[#allocation5 + $0xce8] sm:$0xff] }
 0x152   :  { %v2498_v56 = vpack.c.bf16 %v1458_v50, %v1456_v21  ;;  %v676_v58 = vld [vmem:[#allocation5 + $0x5e0] sm:$0xff] }
 0x153   :  { %2239 = vmatpush1.bf16.msra.mxu1 %v2238_v3  ;;  %2463 = vmatpush1.bf16.msra.mxu0 %v2462_v4  ;;  %v663_v3 = vld [vmem:[#allocation5 + $0x578] sm:$0xff]  ;;  %v1445_v4 = vld [vmem:[#allocation5 + $0xc68] sm:$0xff]  ;;  %v1556_v50 = vld [vmem:[#allocation5 + $0xd60] sm:$0xff] }
 0x154   :  { %2241 = vmatprep.subr.bf16.mxu1 %v2240_v7  ;;  %2465 = vmatprep.subr.bf16.mxu0 %v2464_v8  ;;  %v660_v7 = vld [vmem:[#allocation5 + $0x560] sm:$0xff]  ;;  %v662_v8 = vld [vmem:[#allocation5 + $0x570] sm:$0xff]  ;;  %v2260_v9 = vpack.c.bf16 %v663_v3, %v661_v1  ;;  %v2484_v10 = vpack.c.bf16 %v1447_v5, %v1445_v4  ;;  %v761_v3 = vld [vmem:[#allocation5 + $0x608] sm:$0xff] }
 0x155   :  { %v2262_v19 = vpack.c.bf16 %v662_v8, %v660_v7  ;;  %v1462_v1 = vld [vmem:[#allocation5 + $0xcf0] sm:$0xff]  ;;  %v763_v4 = vld [vmem:[#allocation5 + $0x618] sm:$0xff]  ;;  %v1545_v5 = vld [vmem:[#allocation5 + $0xd08] sm:$0xff] }
 0x156   :  { %v2502_v7 = vpack.c.bf16 %v1462_v1, %v1460_v0  ;;  %v760_v8 = vld [vmem:[#allocation5 + $0x600] sm:$0xff]  ;;  %v2280_v11 = vpack.c.bf16 %v763_v4, %v761_v3  ;;  %v1562_v3 = vld [vmem:[#allocation5 + $0xd90] sm:$0xff]  ;;  %v781_v4 = vld [vmem:[#allocation5 + $0x6a8] sm:$0xff] }
 0x157   :  { %2243 = vmatpush1.bf16.msra.mxu1 %v2242_v17  ;;  %2467 = vmatpush1.bf16.msra.mxu0 %v2466_v18  ;;  %v1449_v17 = vld [vmem:[#allocation5 + $0xc88] sm:$0xff]  ;;  %v1451_v18 = vld [vmem:[#allocation5 + $0xc98] sm:$0xff]  ;;  %v1560_v1 = vld [vmem:[#allocation5 + $0xd80] sm:$0xff] }
 0x158   :  { %2245 = vmatprep.subr.bf16.mxu1 %v2244_v23  ;;  %2469 = vmatprep.subr.bf16.mxu0 %v2468_v24  ;;  %v664_v23 = vld [vmem:[#allocation5 + $0x580] sm:$0xff]  ;;  %v666_v24 = vld [vmem:[#allocation5 + $0x590] sm:$0xff]  ;;  %v2488_v26 = vpack.c.bf16 %v1451_v18, %v1449_v17  ;;  %v765_v17 = vld [vmem:[#allocation5 + $0x628] sm:$0xff] }
 0x159   :  { %v2266_v32 = vpack.c.bf16 %v666_v24, %v664_v23  ;;  %v767_v18 = vld [vmem:[#allocation5 + $0x638] sm:$0xff]  ;;  %v2506_v24 = vpack.c.bf16 %v1546_v15, %v1544_v14  ;;  %v1564_v14 = vld [vmem:[#allocation5 + $0xda0] sm:$0xff]  ;;  %v1566_v15 = vld [vmem:[#allocation5 + $0xdb0] sm:$0xff] }
 0x15a   :  { %v2284_v27 = vpack.c.bf16 %v767_v18, %v765_v17  ;;  %v785_v17 = vld [vmem:[#allocation5 + $0x6c8] sm:$0xff]  ;;  %v787_v18 = vld [vmem:[#allocation5 + $0x6d8] sm:$0xff] }
 0x15b   :  { %2247 = vmatpush1.bf16.msra.mxu1 %v2246_v2  ;;  %2471 = vmatpush1.bf16.msra.mxu0 %v2470_v31  ;;  %v1453_v2 = vld [vmem:[#allocation5 + $0xca8] sm:$0xff]  ;;  %v1455_v31 = vld [vmem:[#allocation5 + $0xcb8] sm:$0xff] }
 0x15c   :  { %2249 = vmatprep.subr.bf16.mxu1 %v2248_v35  ;;  %2473 = vmatprep.subr.bf16.mxu0 %v2472_v36  ;;  %v670_v35 = vld [vmem:[#allocation5 + $0x5b0] sm:$0xff]  ;;  %v2268_v36 = vpack.c.bf16 %v671_v30, %v669_v29  ;;  %v2492_v37 = vpack.c.bf16 %v1455_v31, %v1453_v2  ;;  %v1548_v29 = vld [vmem:[#allocation5 + $0xd20] sm:$0xff]  ;;  %v769_v2 = vld [vmem:[#allocation5 + $0x648] sm:$0xff] }
 0x15d   :  { %v1550_v30 = vld [vmem:[#allocation5 + $0xd30] sm:$0xff]  ;;  %v771_v31 = vld [vmem:[#allocation5 + $0x658] sm:$0xff] }
 0x15e   :  { %2029 = vmatmul.mubr.msk.f32.vlgmr.msra.gmra.mrb[0].mxu1 %vm532_vm9, %v2873_v20  ;;  %2043 = vmatmul.mubr.msk.f32.vlgmr.msra.gmra.mrb[0].mxu0 %vm1316_vm8, %v2873_v20  ;;  %v2288_v38 = vpack.c.bf16 %v771_v31, %v769_v2  ;;  %v789_v2 = vld [vmem:[#allocation5 + $0x6e8] sm:$0xff]  ;;  %v791_v31 = vld [vmem:[#allocation5 + $0x6f8] sm:$0xff] }
 0x15f   :  { %2251 = vmatpush1.bf16.msra.mxu1 %v2250_v43  ;;  %2475 = vmatpush1.bf16.msra.mxu0 %v2474_v44  ;;  %v1459_v43 = vld [vmem:[#allocation5 + $0xcd8] sm:$0xff]  ;;  %v2270_v44 = vpack.c.bf16 %v670_v35, %v668_v34  ;;  %v2510_v35 = vpack.c.bf16 %v1550_v30, %v1548_v29  ;;  %v1568_v29 = vld [vmem:[#allocation5 + $0xdc0] sm:$0xff]  ;;  %v1570_v30 = vld [vmem:[#allocation5 + $0xdd0] sm:$0xff] }
 0x160   :  { %2253 = vmatprep.subr.bf16.mxu1 %v2252_v47  ;;  %2477 = vmatprep.subr.bf16.mxu0 %v2476_v48  ;;  %v674_v47 = vld [vmem:[#allocation5 + $0x5d0] sm:$0xff]  ;;  %v2272_v48 = vpack.c.bf16 %v675_v41, %v673_v40  ;;  %v2496_v49 = vpack.c.bf16 %v1459_v43, %v1457_v42  ;;  %v1552_v40 = vld [vmem:[#allocation5 + $0xd40] sm:$0xff]  ;;  %v773_v42 = vld [vmem:[#allocation5 + $0x668] sm:$0xff] }
 0x161   :  { %744 = vmatprep.mubr.f32.mxu1 %v2858_v13  ;;  %1528 = vmatprep.mubr.f32.mxu0 %v2858_v13  ;;  %v1554_v41 = vld [vmem:[#allocation5 + $0xd50] sm:$0xff]  ;;  %v775_v43 = vld [vmem:[#allocation5 + $0x678] sm:$0xff] }
 0x163   :  { %2255 = vmatpush1.bf16.msra.mxu1 %v2254_v54  ;;  %2479 = vmatpush1.bf16.msra.mxu0 %v2478_v55  ;;  %v1463_v54 = vld [vmem:[#allocation5 + $0xcf8] sm:$0xff]  ;;  %v2274_v55 = vpack.c.bf16 %v674_v47, %v672_v46  ;;  %v2514_v46 = vpack.c.bf16 %v1554_v41, %v1552_v40  ;;  %v772_v47 = vld [vmem:[#allocation5 + $0x660] sm:$0xff]  ;;  %v790_v40 = vld [vmem:[#allocation5 + $0x6f0] sm:$0xff] }
 0x164   :  { %2257 = vmatprep.subr.bf16.mxu1 %v2256_v59  ;;  %2481 = vmatprep.subr.bf16.mxu0 %v2480_v61  ;;  %v678_v59 = vld [vmem:[#allocation5 + $0x5f0] sm:$0xff]  ;;  %v2276_v61 = vpack.c.bf16 %v679_v52, %v677_v51  ;;  %v2500_v62 = vpack.c.bf16 %v1463_v54, %v1461_v53  ;;  %v777_v52 = vld [vmem:[#allocation5 + $0x688] sm:$0xff]  ;;  %v779_v53 = vld [vmem:[#allocation5 + $0x698] sm:$0xff] }
 0x165   :  { %v1558_v51 = vld [vmem:[#allocation5 + $0xd70] sm:$0xff]  ;;  %v1561_v54 = vld [vmem:[#allocation5 + $0xd88] sm:$0xff]  ;;  %v1572_v41 = vld [vmem:[#allocation5 + $0xde0] sm:$0xff] }
 0x167   :  { %2259 = vmatpush1.bf16.msra.mxu1 %v2258_v60  ;;  %2483 = vmatpush1.bf16.msra.mxu0 %v2482_v6  ;;  %v1547_v60 = vld [vmem:[#allocation5 + $0xd18] sm:$0xff]  ;;  %v2278_v6 = vpack.c.bf16 %v678_v59, %v676_v58  ;;  %v2518_v58 = vpack.c.bf16 %v1558_v51, %v1556_v50  ;;  %v776_v59 = vld [vmem:[#allocation5 + $0x680] sm:$0xff] }
 0x168   :  { %2261 = vmatprep.subr.bf16.mxu1 %v2260_v9  ;;  %2485 = vmatprep.subr.bf16.mxu0 %v2484_v10  ;;  %v762_v9 = vld [vmem:[#allocation5 + $0x610] sm:$0xff]  ;;  %v643_v10 = vpop.permute.xlu1 %642  ;;  %v2504_v12 = vpack.c.bf16 %v1547_v60, %v1545_v5  ;;  %v783_v5 = vld [vmem:[#allocation5 + $0x6b8] sm:$0xff]  ;;  %v1565_v60 = vld [vmem:[#allocation5 + $0xda8] sm:$0xff] }
 0x169   :  { %vm644_vm11 = vcmp.eq.s32.totalorder %v2985_v63, %v643_v10  ;;  %v2282_v23 = vpack.c.bf16 %v762_v9, %v760_v8  ;;  %v2522_v8 = vpack.c.bf16 %v1562_v3, %v1560_v1  ;;  %v780_v9 = vld [vmem:[#allocation5 + $0x6a0] sm:$0xff]  ;;  %v782_v10 = vld [vmem:[#allocation5 + $0x6b0] sm:$0xff]  ;;  %v1663_v50 = vld [vmem:[#allocation5 + $0xe38] sm:$0xff] }
 0x16a   :  { %v1671_v1 = vld [vmem:[#allocation5 + $0xe78] sm:$0xff] }
 0x16b   :  { %2263 = vmatpush1.bf16.msra.mxu1 %v2262_v19  ;;  %2487 = vmatpush1.bf16.msra.mxu0 %v2486_v22  ;;  %v1549_v19 = vld [vmem:[#allocation5 + $0xd28] sm:$0xff]  ;;  %v1551_v22 = vld [vmem:[#allocation5 + $0xd38] sm:$0xff] }
 0x16c   :  { %2265 = vmatprep.subr.bf16.mxu1 %v2264_v25  ;;  %2489 = vmatprep.subr.bf16.mxu0 %v2488_v26  ;;  %v764_v25 = vld [vmem:[#allocation5 + $0x620] sm:$0xff]  ;;  %v766_v26 = vld [vmem:[#allocation5 + $0x630] sm:$0xff]  ;;  %v2508_v28 = vpack.c.bf16 %v1551_v22, %v1549_v19  ;;  %v1569_v19 = vld [vmem:[#allocation5 + $0xdc8] sm:$0xff] }
 0x16d   :  { %v2286_v34 = vpack.c.bf16 %v766_v26, %v764_v25  ;;  %v1571_v22 = vld [vmem:[#allocation5 + $0xdd8] sm:$0xff]  ;;  %v784_v25 = vld [vmem:[#allocation5 + $0x6c0] sm:$0xff]  ;;  %v786_v26 = vld [vmem:[#allocation5 + $0x6d0] sm:$0xff] }
 0x16f   :  { %2267 = vmatpush1.bf16.msra.mxu1 %v2266_v32  ;;  %2491 = vmatpush1.bf16.msra.mxu0 %v2490_v33  ;;  %v1553_v32 = vld [vmem:[#allocation5 + $0xd48] sm:$0xff]  ;;  %v1555_v33 = vld [vmem:[#allocation5 + $0xd58] sm:$0xff] }
 0x170   :  { %2269 = vmatprep.subr.bf16.mxu1 %v2268_v36  ;;  %2493 = vmatprep.subr.bf16.mxu0 %v2492_v37  ;;  %v768_v36 = vld [vmem:[#allocation5 + $0x640] sm:$0xff]  ;;  %v770_v37 = vld [vmem:[#allocation5 + $0x650] sm:$0xff]  ;;  %v2512_v39 = vpack.c.bf16 %v1555_v33, %v1553_v32  ;;  %v1573_v32 = vld [vmem:[#allocation5 + $0xde8] sm:$0xff] }
 0x171   :  { %v2290_v16 = vpack.c.bf16 %v770_v37, %v768_v36  ;;  %v1575_v33 = vld [vmem:[#allocation5 + $0xdf8] sm:$0xff]  ;;  %v2530_v36 = vpack.c.bf16 %v1570_v30, %v1568_v29  ;;  %v788_v37 = vld [vmem:[#allocation5 + $0x6e0] sm:$0xff] }
 0x172   :  { %v1687_v29 = vld [vmem:[#allocation5 + $0xef8] sm:$0xff] }
 0x173   :  { %2271 = vmatpush1.bf16.msra.mxu1 %v2270_v44  ;;  %2495 = vmatpush1.bf16.msra.mxu0 %v2494_v45  ;;  %v1557_v44 = vld [vmem:[#allocation5 + $0xd68] sm:$0xff]  ;;  %v1559_v45 = vld [vmem:[#allocation5 + $0xd78] sm:$0xff] }
 0x174   :  { %2273 = vmatprep.subr.bf16.mxu1 %v2272_v48  ;;  %2497 = vmatprep.subr.bf16.mxu0 %v2496_v49  ;;  %v774_v48 = vld [vmem:[#allocation5 + $0x670] sm:$0xff]  ;;  %v2292_v49 = vpack.c.bf16 %v775_v43, %v773_v42  ;;  %v2516_v21 = vpack.c.bf16 %v1559_v45, %v1557_v44  ;;  %v1657_v43 = vld [vmem:[#allocation5 + $0xe08] sm:$0xff]  ;;  %v1659_v44 = vld [vmem:[#allocation5 + $0xe18] sm:$0xff]  ;;  %v2310_v45 = vpack.c.bf16 %v790_v40, %v788_v37 }
 0x175   :  { %v1574_v42 = vld [vmem:[#allocation5 + $0xdf0] sm:$0xff]  ;;  %v1773_v40 = vld [vmem:[#allocation5 + $0xf28] sm:$0xff] }
 0x177   :  { %2275 = vmatpush1.bf16.msra.mxu1 %v2274_v55  ;;  %2499 = vmatpush1.bf16.msra.mxu0 %v2498_v56  ;;  %v1563_v55 = vld [vmem:[#allocation5 + $0xd98] sm:$0xff]  ;;  %v2294_v56 = vpack.c.bf16 %v774_v48, %v772_v47  ;;  %v2536_v47 = vpack.c.bf16 %v1659_v44, %v1657_v43  ;;  %v1656_v48 = vld [vmem:[#allocation5 + $0xe00] sm:$0xff] }
 0x178   :  { %2277 = vmatprep.subr.bf16.mxu1 %v2276_v61  ;;  %2501 = vmatprep.subr.bf16.mxu0 %v2500_v62  ;;  %v778_v61 = vld [vmem:[#allocation5 + $0x690] sm:$0xff]  ;;  %v2296_v62 = vpack.c.bf16 %v779_v53, %v777_v52  ;;  %v2520_v0 = vpack.c.bf16 %v1563_v55, %v1561_v54  ;;  %v1660_v53 = vld [vmem:[#allocation5 + $0xe20] sm:$0xff]  ;;  %v1665_v55 = vld [vmem:[#allocation5 + $0xe48] sm:$0xff] }
 0x179   :  { %v1662_v54 = vld [vmem:[#allocation5 + $0xe30] sm:$0xff]  ;;  %v1772_v44 = vld [vmem:[#allocation5 + $0xf20] sm:$0xff] }
 0x17b   :  { %2279 = vmatpush1.bf16.msra.mxu1 %v2278_v6  ;;  %2503 = vmatpush1.bf16.msra.mxu0 %v2502_v7  ;;  %v1567_v6 = vld [vmem:[#allocation5 + $0xdb8] sm:$0xff]  ;;  %v2298_v7 = vpack.c.bf16 %v778_v61, %v776_v59  ;;  %v1664_v61 = vld [vmem:[#allocation5 + $0xe40] sm:$0xff] }
 0x17c   :  { %2281 = vmatprep.subr.bf16.mxu1 %v2280_v11  ;;  %2505 = vmatprep.subr.bf16.mxu0 %v2504_v12  ;;  %v2300_v11 = vpack.c.bf16 %v783_v5, %v781_v4  ;;  %v2524_v12 = vpack.c.bf16 %v1567_v6, %v1565_v60  ;;  %v1668_v5 = vld [vmem:[#allocation5 + $0xe60] sm:$0xff]  ;;  %v1670_v60 = vld [vmem:[#allocation5 + $0xe70] sm:$0xff]  ;;  %v1673_v6 = vld [vmem:[#allocation5 + $0xe88] sm:$0xff] }
 0x17e   :  { %2031 = vmatmul.mubr.msk.f32.vlgmr.msra.gmra.mrb[0].mxu1 %vm644_vm11, %v2873_v20  ;;  %2045 = vmatmul.mubr.msk.f32.vlgmr.msra.gmra.mrb[0].mxu0 %vm1428_vm10, %v2873_v20 }
 0x17f   :  { %2283 = vmatpush1.bf16.msra.mxu1 %v2282_v23  ;;  %2507 = vmatpush1.bf16.msra.mxu0 %v2506_v24  ;;  %v2302_v23 = vpack.c.bf16 %v782_v10, %v780_v9  ;;  %v2526_v24 = vpack.c.bf16 %v1566_v15, %v1564_v14  ;;  %v1672_v10 = vld [vmem:[#allocation5 + $0xe80] sm:$0xff]  ;;  %v1679_v14 = vld [vmem:[#allocation5 + $0xeb8] sm:$0xff] }
 0x180   :  { %2285 = vmatprep.subr.bf16.mxu1 %v2284_v27  ;;  %2509 = vmatprep.subr.bf16.mxu0 %v2508_v28  ;;  %v2304_v27 = vpack.c.bf16 %v787_v18, %v785_v17  ;;  %v2528_v28 = vpack.c.bf16 %v1571_v22, %v1569_v19  ;;  %v1676_v18 = vld [vmem:[#allocation5 + $0xea0] sm:$0xff]  ;;  %v1678_v19 = vld [vmem:[#allocation5 + $0xeb0] sm:$0xff]  ;;  %v1681_v22 = vld [vmem:[#allocation5 + $0xec8] sm:$0xff] }
 0x181   :  { %856 = vmatprep.mubr.f32.mxu1 %v2858_v13  ;;  %1640 = vmatprep.mubr.f32.mxu0 %v2858_v13 }
 0x183   :  { %2287 = vmatpush1.bf16.msra.mxu1 %v2286_v34  ;;  %2511 = vmatpush1.bf16.msra.mxu0 %v2510_v35  ;;  %v1539_v34 = vpop.permute.xlu0 %1538  ;;  %v2306_v35 = vpack.c.bf16 %v786_v26, %v784_v25  ;;  %v1680_v26 = vld [vmem:[#allocation5 + $0xec0] sm:$0xff] }
 0x184   :  { %2289 = vmatprep.subr.bf16.mxu1 %v2288_v38  ;;  %2513 = vmatprep.subr.bf16.mxu0 %v2512_v39  ;;  %v2308_v38 = vpack.c.bf16 %v791_v31, %v789_v2  ;;  %v2532_v39 = vpack.c.bf16 %v1575_v33, %v1573_v32  ;;  %vm1540_vm12 = vcmp.eq.s32.totalorder %v2985_v63, %v1539_v34  ;;  %v1684_v31 = vld [vmem:[#allocation5 + $0xee0] sm:$0xff]  ;;  %v1686_v32 = vld [vmem:[#allocation5 + $0xef0] sm:$0xff]  ;;  %v1769_v33 = vld [vmem:[#allocation5 + $0xf08] sm:$0xff] }
 0x185   :  { %v1771_v34 = vld [vmem:[#allocation5 + $0xf18] sm:$0xff] }
 0x186   :  { %v2568_v37 = vpack.c.bf16 %v1771_v34, %v1769_v33  ;;  %v1896_v33 = vld [vmem:[#allocation8 + $0x18] sm:$0xff]  ;;  %v1913_v34 = vld [vmem:[#allocation8 + $0xa0] sm:$0xff] }
 0x187   :  { %2291 = vmatpush1.bf16.msra.mxu1 %v2290_v16  ;;  %2515 = vmatpush1.bf16.msra.mxu0 %v2514_v46  ;;  %v2534_v16 = vpack.c.bf16 %v1574_v42, %v1572_v41  ;;  %v755_v46 = vpop.permute.xlu0 %754  ;;  %v1775_v41 = vld [vmem:[#allocation5 + $0xf38] sm:$0xff] }
 0x188   :  { %2293 = vmatprep.subr.bf16.mxu1 %v2292_v49  ;;  %2517 = vmatprep.subr.bf16.mxu0 %v2516_v21  ;;  %v1658_v49 = vld [vmem:[#allocation5 + $0xe10] sm:$0xff]  ;;  %v1661_v21 = vld [vmem:[#allocation5 + $0xe28] sm:$0xff]  ;;  %vm756_vm13 = vcmp.eq.s32.totalorder %v2985_v63, %v755_v46  ;;  %v2572_v43 = vpack.c.bf16 %v1775_v41, %v1773_v40  ;;  %v1779_v46 = vld [vmem:[#allocation5 + $0xf58] sm:$0xff] }
 0x189   :  { %v2538_v51 = vpack.c.bf16 %v1658_v49, %v1656_v48  ;;  %v2540_v52 = vpack.c.bf16 %v1663_v50, %v1661_v21  ;;  %v1776_v49 = vld [vmem:[#allocation5 + $0xf40] sm:$0xff]  ;;  %v1778_v21 = vld [vmem:[#allocation5 + $0xf50] sm:$0xff]  ;;  %v1781_v50 = vld [vmem:[#allocation5 + $0xf68] sm:$0xff] }
 0x18b   :  { %2295 = vmatpush1.bf16.msra.mxu1 %v2294_v56  ;;  %2519 = vmatpush1.bf16.msra.mxu0 %v2518_v58  ;;  %v1667_v56 = vld [vmem:[#allocation5 + $0xe58] sm:$0xff]  ;;  %v2542_v58 = vpack.c.bf16 %v1662_v54, %v1660_v53  ;;  %v1780_v54 = vld [vmem:[#allocation5 + $0xf60] sm:$0xff] }
 0x18c   :  { %2297 = vmatprep.subr.bf16.mxu1 %v2296_v62  ;;  %2521 = vmatprep.subr.bf16.mxu0 %v2520_v0  ;;  %v2544_v59 = vpack.c.bf16 %v1667_v56, %v1665_v55  ;;  %v1666_v62 = vld [vmem:[#allocation5 + $0xe50] sm:$0xff]  ;;  %v1669_v0 = vld [vmem:[#allocation5 + $0xe68] sm:$0xff] }
 0x18d   :  { %v2546_v3 = vpack.c.bf16 %v1666_v62, %v1664_v61  ;;  %v2548_v4 = vpack.c.bf16 %v1671_v1, %v1669_v0  ;;  %v1782_v55 = vld [vmem:[#allocation5 + $0xf70] sm:$0xff]  ;;  %v1785_v56 = vld [vmem:[#allocation5 + $0xf88] sm:$0xff]  ;;  %v1784_v62 = vld [vmem:[#allocation5 + $0xf80] sm:$0xff] }
 0x18e   :  { %v1789_v0 = vld [vmem:[#allocation5 + $0xfa8] sm:$0xff]  ;;  %v1791_v1 = vld [vmem:[#allocation5 + $0xfb8] sm:$0xff] }
 0x18f   :  { %2299 = vmatpush1.bf16.msra.mxu1 %v2298_v7  ;;  %2523 = vmatpush1.bf16.msra.mxu0 %v2522_v8  ;;  %v1675_v7 = vld [vmem:[#allocation5 + $0xe98] sm:$0xff]  ;;  %v2550_v8 = vpack.c.bf16 %v1670_v60, %v1668_v5  ;;  %v1788_v5 = vld [vmem:[#allocation5 + $0xfa0] sm:$0xff]  ;;  %v1790_v60 = vld [vmem:[#allocation5 + $0xfb0] sm:$0xff] }
 0x190   :  { %2301 = vmatprep.subr.bf16.mxu1 %v2300_v11  ;;  %2525 = vmatprep.subr.bf16.mxu0 %v2524_v12  ;;  %v2552_v9 = vpack.c.bf16 %v1675_v7, %v1673_v6  ;;  %v1674_v11 = vld [vmem:[#allocation5 + $0xe90] sm:$0xff]  ;;  %v1677_v12 = vld [vmem:[#allocation5 + $0xea8] sm:$0xff]  ;;  %v1795_v7 = vld [vmem:[#allocation5 + $0xfd8] sm:$0xff] }
 0x191   :  { %v2554_v15 = vpack.c.bf16 %v1674_v11, %v1672_v10  ;;  %v2556_v17 = vpack.c.bf16 %v1679_v14, %v1677_v12  ;;  %v1793_v6 = vld [vmem:[#allocation5 + $0xfc8] sm:$0xff]  ;;  %v1792_v10 = vld [vmem:[#allocation5 + $0xfc0] sm:$0xff]  ;;  %v1794_v11 = vld [vmem:[#allocation5 + $0xfd0] sm:$0xff] }
 0x192   :  { %v1797_v12 = vld [vmem:[#allocation5 + $0xfe8] sm:$0xff]  ;;  %v1799_v14 = vld [vmem:[#allocation5 + $0xff8] sm:$0xff] }
 0x193   :  { %2303 = vmatpush1.bf16.msra.mxu1 %v2302_v23  ;;  %2527 = vmatpush1.bf16.msra.mxu0 %v2526_v24  ;;  %v1683_v23 = vld [vmem:[#allocation5 + $0xed8] sm:$0xff]  ;;  %v2558_v24 = vpack.c.bf16 %v1678_v19, %v1676_v18  ;;  %v1796_v18 = vld [vmem:[#allocation5 + $0xfe0] sm:$0xff]  ;;  %v1798_v19 = vld [vmem:[#allocation5 + $0xff0] sm:$0xff] }
 0x194   :  { %2305 = vmatprep.subr.bf16.mxu1 %v2304_v27  ;;  %2529 = vmatprep.subr.bf16.mxu0 %v2528_v28  ;;  %v2560_v25 = vpack.c.bf16 %v1683_v23, %v1681_v22  ;;  %v1682_v27 = vld [vmem:[#allocation5 + $0xed0] sm:$0xff]  ;;  %v1685_v28 = vld [vmem:[#allocation5 + $0xee8] sm:$0xff]  ;;  %v2598_v22 = vpack.c.bf16 %v1798_v19, %v1796_v18 }
 0x195   :  { %v2562_v30 = vpack.c.bf16 %v1682_v27, %v1680_v26  ;;  %v2564_v2 = vpack.c.bf16 %v1687_v29, %v1685_v28  ;;  %v1893_v26 = vld [vmem:[#allocation8] sm:$0xff]  ;;  %v1894_v28 = vld [vmem:[#allocation8 + $0x8] sm:$0xff]  ;;  %v1911_v29 = vld [vmem:[#allocation8 + $0x90] sm:$0xff] }
 0x197   :  { %2307 = vmatpush1.bf16.msra.mxu1 %v2306_v35  ;;  %2531 = vmatpush1.bf16.msra.mxu0 %v2530_v36  ;;  %v2566_v35 = vpack.c.bf16 %v1686_v32, %v1684_v31  ;;  %v1651_v36 = vpop.permute.xlu1 %1650  ;;  %v1895_v32 = vld [vmem:[#allocation8 + $0x10] sm:$0xff] }
 0x198   :  { %2309 = vmatprep.subr.bf16.mxu1 %v2308_v38  ;;  %2533 = vmatprep.subr.bf16.mxu0 %v2532_v39  ;;  %v1768_v38 = vld [vmem:[#allocation5 + $0xf00] sm:$0xff]  ;;  %v1770_v39 = vld [vmem:[#allocation5 + $0xf10] sm:$0xff]  ;;  %vm1652_vm14 = vcmp.eq.s32.totalorder %v2985_v63, %v1651_v36  ;;  %v2606_v36 = vpack.c.bf16 %v1896_v33, %v1895_v32 }
 0x199   :  { %v2570_v42 = vpack.c.bf16 %v1770_v39, %v1768_v38  ;;  %v1915_v38 = vld [vmem:[#allocation8 + $0xb0] sm:$0xff]  ;;  %v1916_v39 = vld [vmem:[#allocation8 + $0xb8] sm:$0xff] }
 0x19a   :  { %v2612_v41 = vpack.c.bf16 %v1916_v39, %v1915_v38 }
 0x19b   :  { %2311 = vmatpush1.bf16.msra.mxu1 %v2310_v45  ;;  %2535 = vmatpush1.bf16.msra.mxu0 %v2534_v16  ;;  %v1774_v45 = vld [vmem:[#allocation5 + $0xf30] sm:$0xff]  ;;  %v1777_v16 = vld [vmem:[#allocation5 + $0xf48] sm:$0xff]  ;;  %v1763_v23 = vpop.permute.xlu1 %1762 }
 0x19c   :  { %2537 = vmatprep.subr.bf16.mxu0 %v2536_v47  ;;  %v2574_v47 = vpack.c.bf16 %v1774_v45, %v1772_v44  ;;  %v2576_v48 = vpack.c.bf16 %v1779_v46, %v1777_v16  ;;  %vm1764_vm15 = vcmp.eq.s32.totalorder %v2985_v63, %v1763_v23  ;;  %v1917_v44 = vld [vmem:[#allocation8 + $0xc0] sm:$0xff]  ;;  %v1918_v45 = vld [vmem:[#allocation8 + $0xc8] sm:$0xff] }
 0x19d   :  { %v2616_v46 = vpack.c.bf16 %v1918_v45, %v1917_v44 }
 0x19e   :  { %2033 = vmatmul.mubr.msk.f32.vlgmr.msra.gmra.mrb[0].mxu1 %vm756_vm13, %v2873_v20  ;;  %2047 = vmatmul.mubr.msk.f32.vlgmr.msra.gmra.mrb[0].mxu0 %vm1540_vm12, %v2873_v20 }
 0x19f   :  { %2539 = vmatpush1.bf16.msra.mxu0 %v2538_v51  ;;  %1752 = vmatprep.mubr.f32.mxu0 %v2858_v13  ;;  %v1783_v51 = vld [vmem:[#allocation5 + $0xf78] sm:$0xff] }
 0x1a0   :  { %2541 = vmatprep.subr.bf16.mxu0 %v2540_v52  ;;  %v2578_v52 = vpack.c.bf16 %v1778_v21, %v1776_v49  ;;  %v2580_v53 = vpack.c.bf16 %v1783_v51, %v1781_v50  ;;  %v1919_v49 = vld [vmem:[#allocation8 + $0xd0] sm:$0xff]  ;;  %v1920_v21 = vld [vmem:[#allocation8 + $0xd8] sm:$0xff] }
 0x1a1   :  { %v2620_v51 = vpack.c.bf16 %v1920_v21, %v1919_v49 }
 0x1a3   :  { %2543 = vmatpush1.bf16.msra.mxu0 %v2542_v58  ;;  %v1787_v58 = vld [vmem:[#allocation5 + $0xf98] sm:$0xff] }
 0x1a4   :  { %2545 = vmatprep.subr.bf16.mxu0 %v2544_v59  ;;  %v2582_v59 = vpack.c.bf16 %v1782_v55, %v1780_v54  ;;  %v2584_v61 = vpack.c.bf16 %v1787_v58, %v1785_v56  ;;  %v1921_v55 = vld [vmem:[#allocation8 + $0xe0] sm:$0xff]  ;;  %v1922_v56 = vld [vmem:[#allocation8 + $0xe8] sm:$0xff] }
 0x1a5   :  { %v2624_v58 = vpack.c.bf16 %v1922_v56, %v1921_v55 }
 0x1a7   :  { %2547 = vmatpush1.bf16.msra.mxu0 %v2546_v3 }
 0x1a8   :  { %2549 = vmatprep.subr.bf16.mxu0 %v2548_v4  ;;  %v2588_v4 = vpack.c.bf16 %v1791_v1, %v1789_v0  ;;  %v1924_v0 = vld [vmem:[#allocation8 + $0xf8] sm:$0xff] }
 0x1ab   :  { %2551 = vmatpush1.bf16.msra.mxu0 %v2550_v8  ;;  %v2590_v8 = vpack.c.bf16 %v1790_v60, %v1788_v5 }
 0x1ac   :  { %2553 = vmatprep.subr.bf16.mxu0 %v2552_v9  ;;  %v2592_v9 = vpack.c.bf16 %v1795_v7, %v1793_v6  ;;  %v1876_v7 = vshrl.u32 %v84_v57, 7 }
 0x1af   :  { %2555 = vmatpush1.bf16.msra.mxu0 %v2554_v15  ;;  %v2594_v15 = vpack.c.bf16 %v1794_v11, %v1792_v10  ;;  %v1881_v10 = vsub.s32 1, %v1876_v7 }
 0x1b0   :  { %2557 = vmatprep.subr.bf16.mxu0 %v2556_v17  ;;  %v2596_v17 = vpack.c.bf16 %v1799_v14, %v1797_v12 }
 0x1b3   :  { %2559 = vmatpush1.bf16.msra.mxu0 %v2558_v24  ;;  %v1909_v24 = vld [vmem:[#allocation8 + $0x80] sm:$0xff] }
 0x1b4   :  { %2561 = vmatprep.subr.bf16.mxu0 %v2560_v25  ;;  %v1910_v25 = vld [vmem:[#allocation8 + $0x88] sm:$0xff] }
 0x1b5   :  { %v2600_v27 = vpack.c.bf16 %v1910_v25, %v1909_v24 }
 0x1b7   :  { %2563 = vmatpush1.bf16.msra.mxu0 %v2562_v30  ;;  %v1912_v30 = vld [vmem:[#allocation8 + $0x98] sm:$0xff]  ;;  %2601 = vmatprep.subr.bf16.mxu1 %v2600_v27  ;;  %v2052_v27 = vld [vmem:[#allocation10] ss:$0 sm:$0xff] }
 0x1b8   :  { %2565 = vmatprep.subr.bf16.mxu0 %v2564_v2  ;;  %v2602_v2 = vpack.c.bf16 %v1894_v28, %v1893_v26  ;;  %v2604_v31 = vpack.c.bf16 %v1912_v30, %v1911_v29 }
 0x1ba   :  { %2603 = vmatpush3.bf16.msra.mxu1 %v2602_v2 }
 0x1bb   :  { %2567 = vmatpush1.bf16.msra.mxu0 %v2566_v35  ;;  %v1914_v35 = vld [vmem:[#allocation8 + $0xa8] sm:$0xff]  ;;  %2605 = vmatprep.subr.bf16.mxu1 %v2604_v31 }
 0x1bc   :  { %2569 = vmatprep.subr.bf16.mxu0 %v2568_v37  ;;  %v2608_v63 = vpack.c.bf16 %v1914_v35, %v1913_v34  ;;  %v1897_v37 = vld [vmem:[#allocation8 + $0x20] sm:$0xff] }
 0x1be   :  { %2049 = vmatmul.mubr.msk.f32.vlgmr.msra.gmra.mrb[0].mxu0 %vm1652_vm14, %v2873_v20  ;;  %2607 = vmatpush3.bf16.msra.mxu1 %v2606_v36 }
 0x1bf   :  { %2571 = vmatpush1.bf16.msra.mxu0 %v2570_v42  ;;  %1864 = vmatprep.mubr.f32.mxu0 %v2858_v13  ;;  %v1786_v13 = vld [vmem:[#allocation5 + $0xf90] sm:$0xff] }
 0x1c0   :  { %2573 = vmatprep.subr.bf16.mxu0 %v2572_v43  ;;  %v2586_v3 = vpack.c.bf16 %v1786_v13, %v1784_v62  ;;  %2609 = vmatprep.subr.bf16.mxu1 %v2608_v63  ;;  %v1899_v42 = vld [vmem:[#allocation8 + $0x30] sm:$0xff]  ;;  %v1900_v43 = vld [vmem:[#allocation8 + $0x38] sm:$0xff] }
 0x1c1   :  { %v2614_v16 = vpack.c.bf16 %v1900_v43, %v1899_v42  ;;  %v1923_v13 = vld [vmem:[#allocation8 + $0xf0] sm:$0xff] }
 0x1c2   :  { %v2628_v1 = vpack.c.bf16 %v1924_v0, %v1923_v13 }
 0x1c3   :  { %2575 = vmatpush1.bf16.msra.mxu0 %v2574_v47  ;;  %v1901_v47 = vld [vmem:[#allocation8 + $0x40] sm:$0xff] }
 0x1c4   :  { %2577 = vmatprep.subr.bf16.mxu0 %v2576_v48  ;;  %v1902_v48 = vld [vmem:[#allocation8 + $0x48] sm:$0xff] }
 0x1c5   :  { %v2618_v50 = vpack.c.bf16 %v1902_v48, %v1901_v47 }
 0x1c7   :  { %2579 = vmatpush1.bf16.msra.mxu0 %v2578_v52  ;;  %v1903_v52 = vld [vmem:[#allocation8 + $0x50] sm:$0xff] }
 0x1c8   :  { %2581 = vmatprep.subr.bf16.mxu0 %v2580_v53  ;;  %v1904_v53 = vld [vmem:[#allocation8 + $0x58] sm:$0xff] }
 0x1c9   :  { %v2622_v54 = vpack.c.bf16 %v1904_v53, %v1903_v52 }
 0x1cb   :  { %2583 = vmatpush1.bf16.msra.mxu0 %v2582_v59  ;;  %v1905_v59 = vld [vmem:[#allocation8 + $0x60] sm:$0xff] }
 0x1cc   :  { %2585 = vmatprep.subr.bf16.mxu0 %v2584_v61  ;;  %v1906_v61 = vld [vmem:[#allocation8 + $0x68] sm:$0xff] }
 0x1cd   :  { %v2626_v62 = vpack.c.bf16 %v1906_v61, %v1905_v59 }
 0x1cf   :  { %2587 = vmatpush1.bf16.msra.mxu0 %v2586_v3  ;;  %v1907_v3 = vld [vmem:[#allocation8 + $0x70] sm:$0xff] }
 0x1d0   :  { %2589 = vmatprep.subr.bf16.mxu0 %v2588_v4  ;;  %v1908_v4 = vld [vmem:[#allocation8 + $0x78] sm:$0xff] }
 0x1d1   :  { %v2630_v5 = vpack.c.bf16 %v1908_v4, %v1907_v3 }
 0x1d3   :  { %2591 = vmatpush1.bf16.msra.mxu0 %v2590_v8  ;;  %v1877_v8 = vsub.s32 0, %v1876_v7 }
 0x1d4   :  { %2593 = vmatprep.subr.bf16.mxu0 %v2592_v9  ;;  %v1873_v9 = vld [vmem:[#allocation7] sm:$0x3] }
 0x1d5   :  { %v1878_v11 = vrot.slane %v1873_v9, %v1877_v8  ;;  %v1882_v14 = vrot.slane %v1873_v9, %v1881_v10 }
 0x1d7   :  { %2595 = vmatpush1.bf16.msra.mxu0 %v2594_v15 }
 0x1d8   :  { %2597 = vmatprep.subr.bf16.mxu0 %v2596_v17 }
 0x1db   :  { %2599 = vmatpush1.bf16.msra.mxu0 %v2598_v22 }
 0x1de   :  { %2051 = vmatmul.mubr.msk.f32.vlgmr.msra.gmra.mrb[0].mxu0 %vm1764_vm15, %v2873_v20  ;;  %v1898_v20 = vld [vmem:[#allocation8 + $0x28] sm:$0xff] }
 0x1df   :  { %v2610_v40 = vpack.c.bf16 %v1898_v20, %v1897_v37 }
 0x1e1   :  { %2611 = vmatpush3.bf16.msra.mxu1 %v2610_v40 }
 0x1e2   :  { %2613 = vmatprep.subr.bf16.mxu1 %v2612_v41 }
 0x1e5   :  { %2615 = vmatpush3.bf16.msra.mxu1 %v2614_v16 }
 0x1e6   :  { %2617 = vmatprep.subr.bf16.mxu1 %v2616_v46 }
 0x1e9   :  { %2619 = vmatpush3.bf16.msra.mxu1 %v2618_v50 }
 0x1ea   :  { %2621 = vmatprep.subr.bf16.mxu1 %v2620_v51 }
 0x1ed   :  { %2623 = vmatpush3.bf16.msra.mxu1 %v2622_v54 }
 0x1ee   :  { %2625 = vmatprep.subr.bf16.mxu1 %v2624_v58 }
 0x1f1   :  { %2627 = vmatpush3.bf16.msra.mxu1 %v2626_v62 }
 0x1f2   :  { %2629 = vmatprep.subr.bf16.mxu1 %v2628_v1 }
 0x1f5   :  { %2631 = vmatpush3.bf16.msra.mxu1 %v2630_v5 }
 0x271   :  { %v858_v60 = vpop.f32.mrb[0].mxu1 }
 0x272   :  { %v860_v6 = vpop.f32.mrb[1].mxu1 }
 0x2b1   :  { %v1866_v12 = vpop.f32.mrb[0].mxu0 }
 0x2b2   :  { %v2632_v15 = vadd.f32 %v1866_v12, %v858_v60  ;;  %v1868_v17 = vpop.f32.mrb[1].mxu0 }
 0x2b3   :  { %v2633_v18 = vadd.f32 %v1868_v17, %v860_v6 }
 0x2b4   :  { %v1885_v19 = vadd.f32 %v2632_v15, %v1878_v11 }
 0x2b5   :  { %v1886_v22 = vadd.f32 %v2633_v18, %v1882_v14 }
 0x2b6   :  { %v1889_v23 = vmul.f32 0.01, %v1885_v19  ;;  %vm1887_vm1 = vcmp.gt.f32.partialorder %v1885_v19, 0.0 }
 0x2b7   :  { %vm1888_vm0 = vcmp.gt.f32.partialorder %v1886_v22, 0.0  ;;  %v1890_v24 = vmul.f32 0.01, %v1886_v22 }
 0x2b8   :  { %v1891_v26 = vsel %vm1887_vm1, %v1885_v19, %v1889_v23 }
 0x2b9   :  { %v1892_v25 = vsel %vm1888_vm0, %v1886_v22, %v1890_v24 }
 0x2ba   :  { %1996 = vmatprep.mubr.f32.mxu1 %v1892_v25 }
 0x2bb   :  { %1997 = vmatmul.mubr.f32.vlgmr.msra.gmra.mrb[2].mxu1 %v1891_v26 }
 0x38e   :  { %v2085_v57 = vpop.f32.mrb[2].mxu1 }
 0x38f   :  { %v2086_v28 = vpop.f32.mrb[3].mxu1 }
 0x390   :  { %v2087_v29 = vadd.f32 %v2086_v28, %v2085_v57 }
 0x392   :  { %v1999_v30 = vadd.f32 %v2087_v29, %v2052_v27 }
 0x394   :  { %2002 = vst [vmem:[#allocation11] sm:$0xff] %v1999_v30 }
 0x395   :  { %2828 = shalt.err (!%p2825_p2)
}
 0x396   :  { %s2829_s6 = scalar_lea.hbm %s3072_s5, 128 }
 0x397   :  { %p2830_p3 = scmp.ne.s32.totalorder %s3072_s5, %s2829_s6  ;;  %p2833_p4 = scmp.lt.u32.totalorder %s2829_s6, %s3072_s5 }
 0x399   :  { %p2835_p5 = pnand %p2833_p4, %p2830_p3 }
 0x39b   :  { %2838 = shalt.err (!%p2835_p5)
}
 0x39c   :  { %2012 = dma.vmem_to_hbm [thread:$0]  %s2010_s28, 128, %s3072_s5, [#allocation4]  }
 0x39d   :  { %2845 = dma.done.wait [#allocation4], 128  }
 0x39e   :  { %2846 = vsyncadd [#allocation4], 4294967168 }
 0x39f   :  { %2016 = vsyncpa [#allocation3], 1 }
 0x3a0   :  { %2017 = vsyncpa [#allocation6], 1 }
 0x3a1   :  { %2018 = vsyncpa [#allocation9], 1 }
 0x3a2   :  { %2019 = vsyncpa [#allocation4], 1 }

</bundles_post_ra>
